<compile_context>
chip_gen: v5e
topology: v5e:2x2
jax: 0.10.0
libtpu: 0.0.40
codegen_flags: <defaults>
</compile_context>

<pallas_src>
import jax
import jax.numpy as jnp
from jax.experimental import pallas as pl
from jax.experimental.pallas import tpu as pltpu

LEAKY_SLOPE = 0.01   # torch.nn.LeakyReLU default negative_slope
BN_EPS = 1e-5        # torch.nn.BatchNorm1d default eps


# ------------------------------------------------------------------ kernel ---
def _fused_mlp_kernel(x1_ref, x2_ref, w_in_ref, wk128_ref, wk256_ref, wk512_ref,
                      bias_ref, o_ref):
    """Whole forward pass (2 encoders + implicit concat + 2 decoders) in VMEM."""
    f32 = jnp.float32
    bf16 = jnp.bfloat16

    def leaky(y):                       # slope < 1  =>  max(y, slope*y) == LeakyReLU
        return jnp.maximum(y, LEAKY_SLOPE * y)

    def mm(a, w):                       # bf16 MXU feed, f32 accumulation
        return jnp.dot(a.astype(bf16), w, preferred_element_type=f32)

    def bias(row, width):               # (1, width) f32 bias row, broadcasts over batch
        return bias_ref[row:row + 1, 0:width]

    # ---- encoders: branch-1 / branch-2 fused lane-wise; concat is implicit ----
    x = jnp.concatenate([x1_ref[...], x2_ref[...]], axis=1)              # (B, 2n) f32
    h = jnp.dot(x, w_in_ref[...], preferred_element_type=f32)            # enc L0 -> (B, 256)
    h = leaky(h + bias(0, 256))
    h = leaky(mm(h, wk256_ref[:, 0:512]) + bias(1, 512))                 # enc L1 -> (B, 512)
    h = leaky(mm(h, wk512_ref[...]) + bias(2, 256))                      # enc L2 -> (B, 256)
    h = leaky(mm(h, wk256_ref[:, 512:768]) + bias(3, 256))               # enc L3 -> (B, 256)
    h = leaky(mm(h, wk256_ref[:, 1024:1152]) + bias(4, 128))             # enc L4 -> (B, 128)
    f = leaky(mm(h, wk128_ref[:, 0:128]) + bias(5, 128))                 # enc L5 -> (B, 128) = [f1|f2]

    # ---- decoders: both heads read the same f (lanes 0..127) ----
    h = leaky(mm(f, wk128_ref[:, 128:384]) + bias(6, 256))               # dec L0 -> (B, 256)
    h = leaky(mm(h, wk256_ref[:, 768:1024]) + bias(7, 256))              # dec L1 -> (B, 256)
    h = leaky(mm(h, wk256_ref[:, 1152:1280]) + bias(8, 128))             # dec L2 -> (B, 128)
    h = leaky(mm(h, wk128_ref[:, 384:512]) + bias(9, 128))               # dec L3 -> (B, 128)
    out = mm(h, wk128_ref[:, 512:640]) + bias(10, 128)                   # final heads: col 0 / col 1
    o_ref[...] = out.astype(o_ref.dtype)


def fused_forward_call(x1, x2, params):
    """x1, x2: (B, n) f32 -> (B, 128) f32 output slab (col 0 = log1, col 1 = log2)."""
    B, n = x1.shape
    vmem = pl.BlockSpec(memory_space=pltpu.MemorySpace.VMEM)

    # advisory cost from UNPADDED logical dims (bf16 weights, f32 bias/act)
    enc = [(n, 100), (100, 256), (256, 128), (128, 128), (128, 64), (64, 64)]
    dec = [(128, 128), (128, 128), (128, 64), (64, 32), (32, 1)]
    w_elems = 2 * sum(i * o for i, o in enc + dec)
    b_elems = 2 * sum(o for _, o in enc + dec)
    cost = pl.CostEstimate(flops=2 * B * w_elems, transcendentals=0,
                           bytes_accessed=2 * w_elems + 4 * b_elems
                           + 4 * 2 * B * n + 4 * 2 * B)

    return pl.pallas_call(
        _fused_mlp_kernel,
        out_shape=jax.ShapeDtypeStruct((B, 128), jnp.float32),
        in_specs=[vmem] * 7,
        out_specs=vmem,
        compiler_params=pltpu.CompilerParams(vmem_limit_bytes=32 * 1024 * 1024),
        cost_estimate=cost,
    )(x1, x2, params["w_in"], params["wk128"], params["wk256"], params["wk512"],
      params["bias"])


# ------------------------------------------------------- parameter building ---
def _init_linear(key, in_f, out_f):
    kw, kb = jax.random.split(key)
    bound = 1.0 / jnp.sqrt(jnp.float32(in_f))
    w = jax.random.uniform(kw, (out_f, in_f), jnp.float32, -bound, bound)
    b = jax.random.uniform(kb, (out_f,), jnp.float32, -bound, bound)
    return w, b


def _init_block(key, in_f, out_f):
    """Linear + BatchNorm1d (eval) folded -> (w:(in,out), b:(out,))."""
    k1, k2, k3, k4, k5 = jax.random.split(key, 5)
    w, b = _init_linear(k1, in_f, out_f)
    gamma = jax.random.uniform(k2, (out_f,), jnp.float32, 0.5, 1.5)
    beta = jax.random.uniform(k3, (out_f,), jnp.float32, -0.1, 0.1)
    running_mean = 0.1 * jax.random.normal(k4, (out_f,), jnp.float32)
    running_var = jax.random.uniform(k5, (out_f,), jnp.float32, 0.5, 1.5)
    scale = gamma / jnp.sqrt(running_var + BN_EPS)
    w_fused = (w * scale[:, None]).T             # (in, out)
    b_fused = (b - running_mean) * scale + beta  # (out,)
    return w_fused, b_fused


ENC_DIMS = [(None, 100), (100, 256), (256, 128), (128, 128), (128, 64), (64, 64)]
DEC_DIMS = [(128, 128), (128, 128), (128, 64), (64, 32)]


def make_encoder_raw(key, n):
    dims = [(n, 100)] + ENC_DIMS[1:]
    keys = jax.random.split(key, len(dims))
    return [_init_block(k, i, o) for k, (i, o) in zip(keys, dims)]


def make_decoder_raw(key):
    keys = jax.random.split(key, len(DEC_DIMS) + 1)
    blocks = [_init_block(k, i, o) for k, (i, o) in zip(keys[:-1], DEC_DIMS)]
    wf, bf = _init_linear(keys[-1], 32, 1)       # final Linear(32, 1), no BN/act
    return blocks, (wf.T, bf)                    # wf stored as (in=32, out=1)


# --- fuse the two branches into dense, 128-lane-aligned slabs (bf16 weights) ---
#
# Activation lane layouts inside the kernel:
#   enc L0 out (256): b1 @ 0..99   | b2 @ 128..227
#   enc L1 out (512): b1 @ 0..255  | b2 @ 256..511
#   enc L2/L3 (256):  b1 @ 0..127  | b2 @ 128..255
#   enc L4/L5 (128):  b1 @ 0..63   | b2 @ 64..127      -> f = [f1 | f2] (implicit concat)
#   dec L0/L1 (256):  d1 @ 0..127  | d2 @ 128..255
#   dec L2/L3 (128):  d1 @ 0..63/0..31 | d2 @ 64..127/32..63
#   output (128):     col 0 = log1, col 1 = log2
def fuse_params(enc1, enc2, dec1, dec2):
    d1, (wf1, bf1) = dec1
    d2, (wf2, bf2) = dec2
    n = enc1[0][0].shape[0]

    # layer 0 (kept f32; tiny): rows 0..n-1 <- x1, rows n..2n-1 <- x2
    w_in = jnp.zeros((2 * n, 256), jnp.float32)
    w_in = w_in.at[0:n, 0:100].set(enc1[0][0])
    w_in = w_in.at[n:2 * n, 128:228].set(enc2[0][0])

    # K=256 slab (256, 1280): [ W1(512) | W3(256) | WD1(256) | W4(128) | WD2(128) ]
    wk256 = jnp.zeros((256, 1280), jnp.float32)
    wk256 = wk256.at[0:100, 0:256].set(enc1[1][0])        # enc L1 (100->256)
    wk256 = wk256.at[128:228, 256:512].set(enc2[1][0])
    wk256 = wk256.at[0:128, 512:640].set(enc1[3][0])      # enc L3 (128->128)
    wk256 = wk256.at[128:256, 640:768].set(enc2[3][0])
    wk256 = wk256.at[0:128, 768:896].set(d1[1][0])        # dec L1 (128->128)
    wk256 = wk256.at[128:256, 896:1024].set(d2[1][0])
    wk256 = wk256.at[0:128, 1024:1088].set(enc1[4][0])    # enc L4 (128->64, dense out)
    wk256 = wk256.at[128:256, 1088:1152].set(enc2[4][0])
    wk256 = wk256.at[0:128, 1152:1216].set(d1[2][0])      # dec L2 (128->64, dense out)
    wk256 = wk256.at[128:256, 1216:1280].set(d2[2][0])

    # K=512 slab (512, 256): enc L2 (256->128 per branch)
    wk512 = jnp.zeros((512, 256), jnp.float32)
    wk512 = wk512.at[0:256, 0:128].set(enc1[2][0])
    wk512 = wk512.at[256:512, 128:256].set(enc2[2][0])

    # K=128 slab (128, 640): [ W5(128) | WD0(256) | WD3(128) | WF(128) ]
    wk128 = jnp.zeros((128, 640), jnp.float32)
    wk128 = wk128.at[0:64, 0:64].set(enc1[5][0])          # enc L5 (64->64, dense in/out)
    wk128 = wk128.at[64:128, 64:128].set(enc2[5][0])
    wk128 = wk128.at[0:128, 128:256].set(d1[0][0])        # dec L0 (both read f = lanes 0..127)
    wk128 = wk128.at[0:128, 256:384].set(d2[0][0])
    wk128 = wk128.at[0:64, 384:416].set(d1[3][0])         # dec L3 (64->32, dense in/out)
    wk128 = wk128.at[64:128, 416:448].set(d2[3][0])
    wk128 = wk128.at[0:32, 512].set(wf1[:, 0])            # final Linear(32,1) -> col 0
    wk128 = wk128.at[32:64, 513].set(wf2[:, 0])           # final Linear(32,1) -> col 1

    # all 11 bias rows in one (16, 512) f32 slab (row i = layer i, zero padded)
    bias = jnp.zeros((16, 512), jnp.float32)
    bias = bias.at[0, 0:100].set(enc1[0][1]);  bias = bias.at[0, 128:228].set(enc2[0][1])
    bias = bias.at[1, 0:256].set(enc1[1][1]);  bias = bias.at[1, 256:512].set(enc2[1][1])
    bias = bias.at[2, 0:128].set(enc1[2][1]);  bias = bias.at[2, 128:256].set(enc2[2][1])
    bias = bias.at[3, 0:128].set(enc1[3][1]);  bias = bias.at[3, 128:256].set(enc2[3][1])
    bias = bias.at[4, 0:64].set(enc1[4][1]);   bias = bias.at[4, 64:128].set(enc2[4][1])
    bias = bias.at[5, 0:64].set(enc1[5][1]);   bias = bias.at[5, 64:128].set(enc2[5][1])
    bias = bias.at[6, 0:128].set(d1[0][1]);    bias = bias.at[6, 128:256].set(d2[0][1])
    bias = bias.at[7, 0:128].set(d1[1][1]);    bias = bias.at[7, 128:256].set(d2[1][1])
    bias = bias.at[8, 0:64].set(d1[2][1]);     bias = bias.at[8, 64:128].set(d2[2][1])
    bias = bias.at[9, 0:32].set(d1[3][1]);     bias = bias.at[9, 32:64].set(d2[3][1])
    bias = bias.at[10, 0].set(bf1[0]);         bias = bias.at[10, 1].set(bf2[0])

    bf16 = jnp.bfloat16
    return dict(w_in=w_in,                      # f32, tiny (layer-0, small K)
                wk128=wk128.astype(bf16),
                wk256=wk256.astype(bf16),
                wk512=wk512.astype(bf16),
                bias=bias)                      # f32


# ------------------------------------------------------------------ forward ---
@jax.jit
def test_model_forward(params, x1, x2):
    out = fused_forward_call(x1, x2, params)   # (B, 128)
    return out[:, 0], out[:, 1]                # nn.Flatten(0) -> (B,)


# ----------------------------------------------------- pure-JAX reference ----
@jax.jit
def reference_forward(enc1, enc2, dec1, dec2, x1, x2):
    hi = jax.lax.Precision.HIGHEST

    def leaky(v):
        return jnp.where(v >= 0.0, v, LEAKY_SLOPE * v)

    def enc_apply(blocks, x):
        for w, b in blocks:
            x = leaky(jnp.dot(x, w, precision=hi) + b)
        return x

    def dec_apply(dec, f):
        blocks, (wf, bf) = dec
        h = f
        for w, b in blocks:
            h = leaky(jnp.dot(h, w, precision=hi) + b)
        return (jnp.dot(h, wf, precision=hi) + bf).reshape(-1)

    f1 = enc_apply(enc1, x1)
    f2 = enc_apply(enc2, x2)
    f = jnp.concatenate((f1, f2), axis=1)
    return dec_apply(dec1, f), dec_apply(dec2, f)


# --------------------------------------------------------------------- main ---
if __name__ == "__main__":
    n = 16   # input feature size per vector
    B = 8    # batch (sublane-friendly)

    root = jax.random.PRNGKey(0)
    k_e1, k_e2, k_d1, k_d2, k_x1, k_x2 = jax.random.split(root, 6)

    enc1 = make_encoder_raw(k_e1, n)
    enc2 = make_encoder_raw(k_e2, n)
    dec1 = make_decoder_raw(k_d1)
    dec2 = make_decoder_raw(k_d2)
    params = fuse_params(enc1, enc2, dec1, dec2)

    x1 = jax.random.normal(k_x1, (B, n), jnp.float32)
    x2 = jax.random.normal(k_x2, (B, n), jnp.float32)

    log1, log2 = test_model_forward(params, x1, x2)
    jax.block_until_ready((log1, log2))

    assert log1.shape == (B,) and log2.shape == (B,)
    assert log1.dtype == jnp.float32 and log2.dtype == jnp.float32

    # correctness check against a plain-JAX f32 reference of the unfused model
    # (bf16 MXU feeds -> small expected drift vs Precision.HIGHEST reference)
    r1, r2 = reference_forward(enc1, enc2, dec1, dec2, x1, x2)
    jax.block_until_ready((r1, r2))
    assert jnp.allclose(log1, r1, atol=3e-2, rtol=3e-2)
    assert jnp.allclose(log2, r2, atol=3e-2, rtol=3e-2)

    print("KERNEL_OK")
</pallas_src>

<mosaic_0001>
module attributes {stable_mosaic.version = 11 : i64} {
  func.func @_fused_mlp_kernel(%arg0: memref<8x16xf32, #tpu.memory_space<vmem>>, %arg1: memref<8x16xf32, #tpu.memory_space<vmem>>, %arg2: memref<32x256xf32, #tpu.memory_space<vmem>>, %arg3: memref<128x640xbf16, #tpu.memory_space<vmem>>, %arg4: memref<256x1280xbf16, #tpu.memory_space<vmem>>, %arg5: memref<512x256xbf16, #tpu.memory_space<vmem>>, %arg6: memref<16x512xf32, #tpu.memory_space<vmem>>, %arg7: memref<8x128xf32, #tpu.memory_space<vmem>>) attributes {dimension_semantics = [], scalar_prefetch = 0 : i64, scratch_operands = 0 : i64, tpu.core_type = #tpu.core_type<tc>} {
    %c0 = arith.constant 0 : index
    %c0_0 = arith.constant 0 : index
    %0 = vector.load %arg0[%c0, %c0_0] : memref<8x16xf32, #tpu.memory_space<vmem>>, vector<8x16xf32>
    %c0_1 = arith.constant 0 : index
    %c0_2 = arith.constant 0 : index
    %1 = vector.load %arg1[%c0_1, %c0_2] : memref<8x16xf32, #tpu.memory_space<vmem>>, vector<8x16xf32>
    %2 = tpu.concatenate %0, %1 in 1 : vector<8x16xf32>, vector<8x16xf32> -> vector<8x32xf32>
    %c0_3 = arith.constant 0 : index
    %c0_4 = arith.constant 0 : index
    %3 = vector.load %arg2[%c0_3, %c0_4] : memref<32x256xf32, #tpu.memory_space<vmem>>, vector<32x256xf32>
    %cst = arith.constant dense<0.000000e+00> : vector<8x256xf32>
    %4 = tpu.matmul %2, %3, %cst {dimension_numbers = #tpu.dot_dimension_numbers<[1], [0], [0], [1], [0, 0, 1, 1], [], []>} : vector<8x32xf32>, vector<32x256xf32>, vector<8x256xf32> -> vector<8x256xf32>
    %c0_5 = arith.constant 0 : index
    %c0_6 = arith.constant 0 : index
    %5 = vector.load %arg6[%c0_5, %c0_6] : memref<16x512xf32, #tpu.memory_space<vmem>>, vector<1x256xf32>
    %6 = vector.broadcast %5 : vector<1x256xf32> to vector<8x256xf32>
    %7 = arith.addf %4, %6 : vector<8x256xf32>
    %cst_7 = arith.constant 0.00999999977 : f32
    %8 = vector.broadcast %cst_7 : f32 to vector<8x256xf32>
    %9 = arith.mulf %8, %7 : vector<8x256xf32>
    %10 = arith.maximumf %7, %9 : vector<8x256xf32>
    %c0_8 = arith.constant 0 : index
    %c0_9 = arith.constant 0 : index
    %11 = vector.load %arg4[%c0_8, %c0_9] : memref<256x1280xbf16, #tpu.memory_space<vmem>>, vector<256x512xbf16>
    %12 = arith.truncf %10 : vector<8x256xf32> to vector<8x256xbf16>
    %cst_10 = arith.constant dense<0.000000e+00> : vector<8x512xf32>
    %13 = tpu.matmul %12, %11, %cst_10 {dimension_numbers = #tpu.dot_dimension_numbers<[1], [0], [0], [1], [0, 0, 1, 1], [], []>} : vector<8x256xbf16>, vector<256x512xbf16>, vector<8x512xf32> -> vector<8x512xf32>
    %c1 = arith.constant 1 : index
    %c0_11 = arith.constant 0 : index
    %14 = vector.load %arg6[%c1, %c0_11] : memref<16x512xf32, #tpu.memory_space<vmem>>, vector<1x512xf32>
    %15 = vector.broadcast %14 : vector<1x512xf32> to vector<8x512xf32>
    %16 = arith.addf %13, %15 : vector<8x512xf32>
    %cst_12 = arith.constant 0.00999999977 : f32
    %17 = vector.broadcast %cst_12 : f32 to vector<8x512xf32>
    %18 = arith.mulf %17, %16 : vector<8x512xf32>
    %19 = arith.maximumf %16, %18 : vector<8x512xf32>
    %c0_13 = arith.constant 0 : index
    %c0_14 = arith.constant 0 : index
    %20 = vector.load %arg5[%c0_13, %c0_14] : memref<512x256xbf16, #tpu.memory_space<vmem>>, vector<512x256xbf16>
    %21 = arith.truncf %19 : vector<8x512xf32> to vector<8x512xbf16>
    %cst_15 = arith.constant dense<0.000000e+00> : vector<8x256xf32>
    %22 = tpu.matmul %21, %20, %cst_15 {dimension_numbers = #tpu.dot_dimension_numbers<[1], [0], [0], [1], [0, 0, 1, 1], [], []>} : vector<8x512xbf16>, vector<512x256xbf16>, vector<8x256xf32> -> vector<8x256xf32>
    %c2 = arith.constant 2 : index
    %c0_16 = arith.constant 0 : index
    %23 = vector.load %arg6[%c2, %c0_16] : memref<16x512xf32, #tpu.memory_space<vmem>>, vector<1x256xf32>
    %24 = vector.broadcast %23 : vector<1x256xf32> to vector<8x256xf32>
    %25 = arith.addf %22, %24 : vector<8x256xf32>
    %cst_17 = arith.constant 0.00999999977 : f32
    %26 = vector.broadcast %cst_17 : f32 to vector<8x256xf32>
    %27 = arith.mulf %26, %25 : vector<8x256xf32>
    %28 = arith.maximumf %25, %27 : vector<8x256xf32>
    %c0_18 = arith.constant 0 : index
    %c512 = arith.constant 512 : index
    %29 = vector.load %arg4[%c0_18, %c512] : memref<256x1280xbf16, #tpu.memory_space<vmem>>, vector<256x256xbf16>
    %30 = arith.truncf %28 : vector<8x256xf32> to vector<8x256xbf16>
    %cst_19 = arith.constant dense<0.000000e+00> : vector<8x256xf32>
    %31 = tpu.matmul %30, %29, %cst_19 {dimension_numbers = #tpu.dot_dimension_numbers<[1], [0], [0], [1], [0, 0, 1, 1], [], []>} : vector<8x256xbf16>, vector<256x256xbf16>, vector<8x256xf32> -> vector<8x256xf32>
    %c3 = arith.constant 3 : index
    %c0_20 = arith.constant 0 : index
    %32 = vector.load %arg6[%c3, %c0_20] : memref<16x512xf32, #tpu.memory_space<vmem>>, vector<1x256xf32>
    %33 = vector.broadcast %32 : vector<1x256xf32> to vector<8x256xf32>
    %34 = arith.addf %31, %33 : vector<8x256xf32>
    %cst_21 = arith.constant 0.00999999977 : f32
    %35 = vector.broadcast %cst_21 : f32 to vector<8x256xf32>
    %36 = arith.mulf %35, %34 : vector<8x256xf32>
    %37 = arith.maximumf %34, %36 : vector<8x256xf32>
    %c0_22 = arith.constant 0 : index
    %c1024 = arith.constant 1024 : index
    %38 = vector.load %arg4[%c0_22, %c1024] : memref<256x1280xbf16, #tpu.memory_space<vmem>>, vector<256x128xbf16>
    %39 = arith.truncf %37 : vector<8x256xf32> to vector<8x256xbf16>
    %cst_23 = arith.constant dense<0.000000e+00> : vector<8x128xf32>
    %40 = tpu.matmul %39, %38, %cst_23 {dimension_numbers = #tpu.dot_dimension_numbers<[1], [0], [0], [1], [0, 0, 1, 1], [], []>} : vector<8x256xbf16>, vector<256x128xbf16>, vector<8x128xf32> -> vector<8x128xf32>
    %c4 = arith.constant 4 : index
    %c0_24 = arith.constant 0 : index
    %41 = vector.load %arg6[%c4, %c0_24] : memref<16x512xf32, #tpu.memory_space<vmem>>, vector<1x128xf32>
    %42 = vector.broadcast %41 : vector<1x128xf32> to vector<8x128xf32>
    %43 = arith.addf %40, %42 : vector<8x128xf32>
    %cst_25 = arith.constant 0.00999999977 : f32
    %44 = vector.broadcast %cst_25 : f32 to vector<8x128xf32>
    %45 = arith.mulf %44, %43 : vector<8x128xf32>
    %46 = arith.maximumf %43, %45 : vector<8x128xf32>
    %c0_26 = arith.constant 0 : index
    %c0_27 = arith.constant 0 : index
    %47 = vector.load %arg3[%c0_26, %c0_27] : memref<128x640xbf16, #tpu.memory_space<vmem>>, vector<128x128xbf16>
    %48 = arith.truncf %46 : vector<8x128xf32> to vector<8x128xbf16>
    %cst_28 = arith.constant dense<0.000000e+00> : vector<8x128xf32>
    %49 = tpu.matmul %48, %47, %cst_28 {dimension_numbers = #tpu.dot_dimension_numbers<[1], [0], [0], [1], [0, 0, 1, 1], [], []>} : vector<8x128xbf16>, vector<128x128xbf16>, vector<8x128xf32> -> vector<8x128xf32>
    %c5 = arith.constant 5 : index
    %c0_29 = arith.constant 0 : index
    %50 = vector.load %arg6[%c5, %c0_29] : memref<16x512xf32, #tpu.memory_space<vmem>>, vector<1x128xf32>
    %51 = vector.broadcast %50 : vector<1x128xf32> to vector<8x128xf32>
    %52 = arith.addf %49, %51 : vector<8x128xf32>
    %cst_30 = arith.constant 0.00999999977 : f32
    %53 = vector.broadcast %cst_30 : f32 to vector<8x128xf32>
    %54 = arith.mulf %53, %52 : vector<8x128xf32>
    %55 = arith.maximumf %52, %54 : vector<8x128xf32>
    %c0_31 = arith.constant 0 : index
    %c128 = arith.constant 128 : index
    %56 = vector.load %arg3[%c0_31, %c128] : memref<128x640xbf16, #tpu.memory_space<vmem>>, vector<128x256xbf16>
    %57 = arith.truncf %55 : vector<8x128xf32> to vector<8x128xbf16>
    %cst_32 = arith.constant dense<0.000000e+00> : vector<8x256xf32>
    %58 = tpu.matmul %57, %56, %cst_32 {dimension_numbers = #tpu.dot_dimension_numbers<[1], [0], [0], [1], [0, 0, 1, 1], [], []>} : vector<8x128xbf16>, vector<128x256xbf16>, vector<8x256xf32> -> vector<8x256xf32>
    %c6 = arith.constant 6 : index
    %c0_33 = arith.constant 0 : index
    %59 = vector.load %arg6[%c6, %c0_33] : memref<16x512xf32, #tpu.memory_space<vmem>>, vector<1x256xf32>
    %60 = vector.broadcast %59 : vector<1x256xf32> to vector<8x256xf32>
    %61 = arith.addf %58, %60 : vector<8x256xf32>
    %cst_34 = arith.constant 0.00999999977 : f32
    %62 = vector.broadcast %cst_34 : f32 to vector<8x256xf32>
    %63 = arith.mulf %62, %61 : vector<8x256xf32>
    %64 = arith.maximumf %61, %63 : vector<8x256xf32>
    %c0_35 = arith.constant 0 : index
    %c768 = arith.constant 768 : index
    %65 = vector.load %arg4[%c0_35, %c768] : memref<256x1280xbf16, #tpu.memory_space<vmem>>, vector<256x256xbf16>
    %66 = arith.truncf %64 : vector<8x256xf32> to vector<8x256xbf16>
    %cst_36 = arith.constant dense<0.000000e+00> : vector<8x256xf32>
    %67 = tpu.matmul %66, %65, %cst_36 {dimension_numbers = #tpu.dot_dimension_numbers<[1], [0], [0], [1], [0, 0, 1, 1], [], []>} : vector<8x256xbf16>, vector<256x256xbf16>, vector<8x256xf32> -> vector<8x256xf32>
    %c7 = arith.constant 7 : index
    %c0_37 = arith.constant 0 : index
    %68 = vector.load %arg6[%c7, %c0_37] : memref<16x512xf32, #tpu.memory_space<vmem>>, vector<1x256xf32>
    %69 = vector.broadcast %68 : vector<1x256xf32> to vector<8x256xf32>
    %70 = arith.addf %67, %69 : vector<8x256xf32>
    %cst_38 = arith.constant 0.00999999977 : f32
    %71 = vector.broadcast %cst_38 : f32 to vector<8x256xf32>
    %72 = arith.mulf %71, %70 : vector<8x256xf32>
    %73 = arith.maximumf %70, %72 : vector<8x256xf32>
    %c0_39 = arith.constant 0 : index
    %c1152 = arith.constant 1152 : index
    %74 = vector.load %arg4[%c0_39, %c1152] : memref<256x1280xbf16, #tpu.memory_space<vmem>>, vector<256x128xbf16>
    %75 = arith.truncf %73 : vector<8x256xf32> to vector<8x256xbf16>
    %cst_40 = arith.constant dense<0.000000e+00> : vector<8x128xf32>
    %76 = tpu.matmul %75, %74, %cst_40 {dimension_numbers = #tpu.dot_dimension_numbers<[1], [0], [0], [1], [0, 0, 1, 1], [], []>} : vector<8x256xbf16>, vector<256x128xbf16>, vector<8x128xf32> -> vector<8x128xf32>
    %c8 = arith.constant 8 : index
    %c0_41 = arith.constant 0 : index
    %77 = vector.load %arg6[%c8, %c0_41] : memref<16x512xf32, #tpu.memory_space<vmem>>, vector<1x128xf32>
    %78 = vector.broadcast %77 : vector<1x128xf32> to vector<8x128xf32>
    %79 = arith.addf %76, %78 : vector<8x128xf32>
    %cst_42 = arith.constant 0.00999999977 : f32
    %80 = vector.broadcast %cst_42 : f32 to vector<8x128xf32>
    %81 = arith.mulf %80, %79 : vector<8x128xf32>
    %82 = arith.maximumf %79, %81 : vector<8x128xf32>
    %c0_43 = arith.constant 0 : index
    %c384 = arith.constant 384 : index
    %83 = vector.load %arg3[%c0_43, %c384] : memref<128x640xbf16, #tpu.memory_space<vmem>>, vector<128x128xbf16>
    %84 = arith.truncf %82 : vector<8x128xf32> to vector<8x128xbf16>
    %cst_44 = arith.constant dense<0.000000e+00> : vector<8x128xf32>
    %85 = tpu.matmul %84, %83, %cst_44 {dimension_numbers = #tpu.dot_dimension_numbers<[1], [0], [0], [1], [0, 0, 1, 1], [], []>} : vector<8x128xbf16>, vector<128x128xbf16>, vector<8x128xf32> -> vector<8x128xf32>
    %c9 = arith.constant 9 : index
    %c0_45 = arith.constant 0 : index
    %86 = vector.load %arg6[%c9, %c0_45] : memref<16x512xf32, #tpu.memory_space<vmem>>, vector<1x128xf32>
    %87 = vector.broadcast %86 : vector<1x128xf32> to vector<8x128xf32>
    %88 = arith.addf %85, %87 : vector<8x128xf32>
    %cst_46 = arith.constant 0.00999999977 : f32
    %89 = vector.broadcast %cst_46 : f32 to vector<8x128xf32>
    %90 = arith.mulf %89, %88 : vector<8x128xf32>
    %91 = arith.maximumf %88, %90 : vector<8x128xf32>
    %c0_47 = arith.constant 0 : index
    %c512_48 = arith.constant 512 : index
    %92 = vector.load %arg3[%c0_47, %c512_48] : memref<128x640xbf16, #tpu.memory_space<vmem>>, vector<128x128xbf16>
    %93 = arith.truncf %91 : vector<8x128xf32> to vector<8x128xbf16>
    %cst_49 = arith.constant dense<0.000000e+00> : vector<8x128xf32>
    %94 = tpu.matmul %93, %92, %cst_49 {dimension_numbers = #tpu.dot_dimension_numbers<[1], [0], [0], [1], [0, 0, 1, 1], [], []>} : vector<8x128xbf16>, vector<128x128xbf16>, vector<8x128xf32> -> vector<8x128xf32>
    %c10 = arith.constant 10 : index
    %c0_50 = arith.constant 0 : index
    %95 = vector.load %arg6[%c10, %c0_50] : memref<16x512xf32, #tpu.memory_space<vmem>>, vector<1x128xf32>
    %96 = vector.broadcast %95 : vector<1x128xf32> to vector<8x128xf32>
    %97 = arith.addf %94, %96 : vector<8x128xf32>
    %c0_51 = arith.constant 0 : index
    %c0_52 = arith.constant 0 : index
    %98 = vector.load %arg7[%c0_51, %c0_52] : memref<8x128xf32, #tpu.memory_space<vmem>>, vector<8x128xf32>
    tpu.vector_store %arg7[%c0_51, %c0_52], %97 {strides = array<i32>} : memref<8x128xf32, #tpu.memory_space<vmem>>, vector<8x128xf32>,
    return
  }
}

</mosaic_0001>

<bundles_post_ra>
// kernel: test_model_forward.1
= control target key start
LH: loop header
LB: loop body
LE: loop exit
PB: predicated region body
PF: predicated region fallthrough
CT: control target
= control target key end

     0   :  { %12 = vsyncpa [#allocation3], 0  ;;  %s4046_s0 = inlined_call_operand.hbm [shape: f32[8,16], index: 0, kind: input, shape index: {}]   ;;  %s4047_s1 = inlined_call_operand.hbm [shape: f32[8,16], index: 1, kind: input, shape index: {}]   ;;  %s4048_s2 = inlined_call_operand.hbm [shape: f32[32,256], index: 2, kind: input, shape index: {}]   ;;  %s4049_s3 = inlined_call_operand.hbm [shape: bf16[128,640], index: 3, kind: input, shape index: {}]   ;;  %s4050_s4 = inlined_call_operand.hbm [shape: bf16[256,1280], index: 4, kind: input, shape index: {}]   ;;  %s4051_s5 = inlined_call_operand.hbm [shape: bf16[512,256], index: 5, kind: input, shape index: {}]   ;;  %s4052_s6 = inlined_call_operand.hbm [shape: f32[16,512], index: 6, kind: input, shape index: {}]   ;;  %s4053_s7 = inlined_call_operand.vmem [shape: f32[8,128], index: 7, kind: output, shape index: {}]  }
   0x1   :  { %13 = vsyncpa [#allocation5], 0 }
   0x2   :  { %14 = vsyncpa [#allocation8], 0  ;;  %s32_s26 = sshll.u32 %s4047_s1, 4  ;;  %s33_s26 = int_to_ptr.hbm [resolvable:$true] %s32_s26 }
   0x3   :  { %15 = vsyncpa [#allocation11], 0  ;;  %s3944_s27 = smov [#allocation4]   ;;  %s55_s8 = sshll.u32 %s4049_s3, 4  ;;  %s56_s8 = int_to_ptr.hbm [resolvable:$true] %s55_s8 }
   0x4   :  { %s34_s28 = sshll.u32 %s3944_s27, 4  ;;  %s3945_s9 = smov [#allocation7]   ;;  %s35_s28 = int_to_ptr.vmem [resolvable:$true] %s34_s28 }
   0x5   :  { %37 = dma.hbm_to_vmem [thread:$0]  %s33_s26, 128, %s35_s28, [#allocation5]  }
   0x6   :  { %s57_s10 = sshll.u32 %s3945_s9, 4  ;;  %s3946_s11 = smov 320   ;;  %s58_s10 = int_to_ptr.vmem [resolvable:$true] %s57_s10 }
   0x7   :  { %s3947_s12 = smov 20   ;;  %s81_s1 = sshll.u32 %s4051_s5, 4  ;;  %s82_s1 = int_to_ptr.hbm [resolvable:$true] %s81_s1 }
   0x8   :  { %63 = dma.hbm_to_vmem [thread:$0]  %s56_s8, 5120, %s58_s10, [#allocation8], %s3946_s11, %s3946_s11, %s3947_s12  }
   0x9   :  { %s3948_s15 = smov [#allocation10]   ;;  %s21_s3 = sshll.u32 %s4046_s0, 4  ;;  %s22_s3 = int_to_ptr.hbm [resolvable:$true] %s21_s3 }
   0xa   :  { %s83_s16 = sshll.u32 %s3948_s15, 4  ;;  %s3949_s19 = smov 128   ;;  %s84_s16 = int_to_ptr.vmem [resolvable:$true] %s83_s16 }
   0xb   :  { %s3950_s20 = smov 8   ;;  %s3951_s21 = smov [#allocation2]  }
   0xc   :  { %89 = dma.hbm_to_vmem [thread:$0]  %s82_s1, 8192, %s84_s16, [#allocation11], %s3949_s19, %s3949_s19, %s3950_s20  }
   0xd   :  { %s23_s22 = sshll.u32 %s3951_s21, 4  ;;  %s42_s25 = sshll.u32 %s4048_s2, 4  ;;  %s24_s22 = int_to_ptr.vmem [resolvable:$true] %s23_s22  ;;  %s43_s25 = int_to_ptr.hbm [resolvable:$true] %s42_s25 }
   0xe   :  { %26 = dma.hbm_to_vmem [thread:$0]  %s22_s3, 128, %s24_s22, [#allocation3]  }
   0xf   :  { %s3952_s5 = smov [#allocation6]   ;;  %s68_s0 = sshll.u32 %s4050_s4, 4  ;;  %s69_s0 = int_to_ptr.hbm [resolvable:$true] %s68_s0 }
  0x10   :  { %s44_s26 = sshll.u32 %s3952_s5, 4  ;;  %s3953_s29 = smov 256   ;;  %s45_s26 = int_to_ptr.vmem [resolvable:$true] %s44_s26 }
  0x11   :  { %s3954_s30 = smov 16   ;;  %s3955_s8 = smov [#allocation9]  }
  0x12   :  { %50 = dma.hbm_to_vmem [thread:$0]  %s43_s25, 1024, %s45_s26, [#allocation5], %s3953_s29, %s3953_s29, %s3954_s30  }
  0x13   :  { %s70_s9 = sshll.u32 %s3955_s8, 4  ;;  %s3956_s10 = smov 640   ;;  %s71_s9 = int_to_ptr.vmem [resolvable:$true] %s70_s9 }
  0x14   :  { %s3957_s11 = smov 40   ;;  %s94_s13 = sshll.u32 %s4052_s6, 4  ;;  %s95_s13 = int_to_ptr.hbm [resolvable:$true] %s94_s13 }
  0x15   :  { %76 = dma.hbm_to_vmem [thread:$0]  %s69_s0, 20480, %s71_s9, [#allocation8], %s3956_s10, %s3956_s10, %s3957_s11  }
  0x16   :  { %s3958_s14 = smov [#allocation12]   ;;  %s3959_s15 = smov 512  }
  0x17   :  { %s96_s1 = sshll.u32 %s3958_s14, 4  ;;  %s3960_s4 = smov 32   ;;  %s97_s1 = int_to_ptr.vmem [resolvable:$true] %s96_s1 }
  0x18   :  { %102 = dma.hbm_to_vmem [thread:$0]  %s95_s13, 1024, %s97_s1, [#allocation11], %s3959_s15, %s3959_s15, %s3960_s4  }
  0x19   :  { %3936 = dma.done.wait [#allocation3], 128  }
  0x1a   :  { %3937 = vsyncadd [#allocation3], 4294967168 }
  0x1b   :  { %3938 = dma.done.wait [#allocation5], 1152  }
  0x1c   :  { %3939 = vsyncadd [#allocation5], 4294966144 }
  0x1d   :  { %3940 = dma.done.wait [#allocation8], 25600  }
  0x1e   :  { %3941 = vsyncadd [#allocation8], 4294941696 }
  0x1f   :  { %3942 = dma.done.wait [#allocation11], 9216  }
  0x20   :  { %3943 = vsyncadd [#allocation11], 4294958080  ;;  %v132_v0 = vld [vmem:[#allocation4] sm:$0xff]  ;;  %v145_v1 = vld [vmem:[#allocation6 + $0x30] sm:$0xff]  ;;  %vm137_vm0 = vcmask 130048   ;;  %vm153_vm1 = vcmask 261120  }
  0x21   :  { %v146_v2 = vld [vmem:[#allocation6 + $0x38] sm:$0xff]  ;;  %134 = vrot.lane.b32.xlu0 %v132_v0, %s3954_s30  ;;  %169 = vmatpush.msra.mxu0 %v145_v1  ;;  %v143_v3 = vld [vmem:[#allocation6 + $0x20] sm:$0xff]  ;;  %v144_v4 = vld [vmem:[#allocation6 + $0x28] sm:$0xff] }
  0x22   :  { %189 = vmatpush.msra.mxu1 %v146_v2  ;;  %v141_v5 = vld [vmem:[#allocation6 + $0x10] sm:$0xff]  ;;  %v142_v6 = vld [vmem:[#allocation6 + $0x18] sm:$0xff]  ;;  %v139_v7 = vld [vmem:[#allocation6] sm:$0xff] }
  0x23   :  { %170 = vmatpush.msra.mxu0 %v143_v3  ;;  %v140_v8 = vld [vmem:[#allocation6 + $0x8] sm:$0xff]  ;;  %v2545_v9 = vld [vmem:[#allocation9 + $0x230] sm:$0xf]  ;;  %v3517_v10 = vld [vmem:[#allocation9 + $0x254] sm:$0xf0] }
  0x24   :  { %190 = vmatpush.msra.mxu1 %v144_v4  ;;  %v2673_v11 = vld [vmem:[#allocation9 + $0x4b0] sm:$0xf]  ;;  %v2546_v12 = vor.u32 %v3517_v10, %v2545_v9  ;;  %v3549_v13 = vld [vmem:[#allocation9 + $0x4d4] sm:$0xf0]  ;;  %v3515_v14 = vld [vmem:[#allocation9 + $0x234] sm:$0xf] }
  0x25   :  { %171 = vmatpush.msra.mxu0 %v141_v5  ;;  %v2547_v15 = vld [vmem:[#allocation9 + $0x258] sm:$0xf0]  ;;  %v2674_v16 = vor.u32 %v3549_v13, %v2673_v11  ;;  %v3547_v18 = vld [vmem:[#allocation9 + $0x4b4] sm:$0xf]  ;;  %v2529_v20 = vld [vmem:[#allocation9 + $0x1e0] sm:$0xf] }
  0x26   :  { %191 = vmatpush.msra.mxu1 %v142_v6  ;;  %v2550_v17 = vor.u32 %v3515_v14, %v2547_v15  ;;  %v2675_v19 = vld [vmem:[#allocation9 + $0x4d8] sm:$0xf0]  ;;  %598 = vmatpush.bf16.msra.mxu2 %v2546_v12  ;;  %v3513_v22 = vld [vmem:[#allocation9 + $0x204] sm:$0xf0]  ;;  %v2657_v23 = vld [vmem:[#allocation9 + $0x460] sm:$0xf] }
  0x27   :  { %172 = vmatpush.msra.mxu0 %v139_v7  ;;  %v2678_v21 = vor.u32 %v3547_v18, %v2675_v19  ;;  %v3545_v24 = vld [vmem:[#allocation9 + $0x484] sm:$0xf0]  ;;  %611 = vmatpush.bf16.msra.mxu3 %v2674_v16  ;;  %v2530_v25 = vor.u32 %v3513_v22, %v2529_v20  ;;  %v3511_v27 = vld [vmem:[#allocation9 + $0x1e4] sm:$0xf]  ;;  %v2531_v28 = vld [vmem:[#allocation9 + $0x208] sm:$0xf0] }
  0x28   :  { %192 = vmatpush.msra.mxu1 %v140_v8  ;;  %v2658_v26 = vor.u32 %v3545_v24, %v2657_v23  ;;  %v3543_v29 = vld [vmem:[#allocation9 + $0x464] sm:$0xf]  ;;  %v2534_v30 = vor.u32 %v3511_v27, %v2531_v28  ;;  %v2659_v31 = vld [vmem:[#allocation9 + $0x488] sm:$0xf0]  ;;  %v2513_v32 = vld [vmem:[#allocation9 + $0x190] sm:$0xf] }
  0x29   :  { %624 = vmatpush.bf16.msrb.mxu0 %v2550_v17  ;;  %v3509_v33 = vld [vmem:[#allocation9 + $0x1b4] sm:$0xf0]  ;;  %v2662_v34 = vor.u32 %v3543_v29, %v2659_v31  ;;  %v2641_v35 = vld [vmem:[#allocation9 + $0x410] sm:$0xf]  ;;  %v3507_v37 = vld [vmem:[#allocation9 + $0x194] sm:$0xf] }
  0x2a   :  { %637 = vmatpush.bf16.msrb.mxu1 %v2678_v21  ;;  %v3541_v36 = vld [vmem:[#allocation9 + $0x434] sm:$0xf0]  ;;  %599 = vmatpush.bf16.msra.mxu2 %v2530_v25  ;;  %v2514_v38 = vor.u32 %v3509_v33, %v2513_v32  ;;  %v2515_v39 = vld [vmem:[#allocation9 + $0x1b8] sm:$0xf0]  ;;  %v3539_v40 = vld [vmem:[#allocation9 + $0x414] sm:$0xf] }
  0x2b   :  { %v2643_v41 = vld [vmem:[#allocation9 + $0x438] sm:$0xf0]  ;;  %612 = vmatpush.bf16.msra.mxu3 %v2658_v26  ;;  %v2642_v42 = vor.u32 %v3541_v36, %v2641_v35  ;;  %v2518_v43 = vor.u32 %v3507_v37, %v2515_v39  ;;  %v2497_v44 = vld [vmem:[#allocation9 + $0x140] sm:$0xf]  ;;  %v3505_v45 = vld [vmem:[#allocation9 + $0x164] sm:$0xf0] }
  0x2c   :  { %v2625_v46 = vld [vmem:[#allocation9 + $0x3c0] sm:$0xf]  ;;  %v2646_v47 = vor.u32 %v3539_v40, %v2643_v41  ;;  %v3537_v48 = vld [vmem:[#allocation9 + $0x3e4] sm:$0xf0]  ;;  %v3503_v49 = vld [vmem:[#allocation9 + $0x144] sm:$0xf]  ;;  %v2498_v53 = vor.u32 %v3505_v45, %v2497_v44 }
  0x2d   :  { %625 = vmatpush.bf16.msrb.mxu0 %v2534_v30  ;;  %v2499_v50 = vld [vmem:[#allocation9 + $0x168] sm:$0xf0]  ;;  %v3535_v51 = vld [vmem:[#allocation9 + $0x3c4] sm:$0xf]  ;;  %v2626_v54 = vor.u32 %v3537_v48, %v2625_v46  ;;  %v2481_v56 = vld [vmem:[#allocation9 + $0xf0] sm:$0xf] }
  0x2e   :  { %638 = vmatpush.bf16.msrb.mxu1 %v2662_v34  ;;  %v2627_v52 = vld [vmem:[#allocation9 + $0x3e8] sm:$0xf0]  ;;  %600 = vmatpush.bf16.msra.mxu2 %v2514_v38  ;;  %v2502_v55 = vor.u32 %v3503_v49, %v2499_v50  ;;  %v3501_v57 = vld [vmem:[#allocation9 + $0x114] sm:$0xf0]  ;;  %v2609_v58 = vld [vmem:[#allocation9 + $0x370] sm:$0xf] }
  0x2f   :  { %613 = vmatpush.bf16.msra.mxu3 %v2642_v42  ;;  %v2630_v59 = vor.u32 %v3535_v51, %v2627_v52  ;;  %v3533_v60 = vld [vmem:[#allocation9 + $0x394] sm:$0xf0]  ;;  %v3499_v61 = vld [vmem:[#allocation9 + $0xf4] sm:$0xf]  ;;  %v2483_v62 = vld [vmem:[#allocation9 + $0x118] sm:$0xf0]  ;;  %v2482_v1 = vor.u32 %v3501_v57, %v2481_v56 }
  0x30   :  { %v3531_v63 = vld [vmem:[#allocation9 + $0x374] sm:$0xf]  ;;  %v2611_v0 = vld [vmem:[#allocation9 + $0x398] sm:$0xf0]  ;;  %v2610_v2 = vor.u32 %v3533_v60, %v2609_v58  ;;  %v2486_v3 = vor.u32 %v3499_v61, %v2483_v62  ;;  %v2465_v4 = vld [vmem:[#allocation9 + $0xa0] sm:$0xf] }
  0x31   :  { %626 = vmatpush.bf16.msrb.mxu0 %v2518_v43  ;;  %v3497_v5 = vld [vmem:[#allocation9 + $0xc4] sm:$0xf0]  ;;  %v2593_v6 = vld [vmem:[#allocation9 + $0x320] sm:$0xf]  ;;  %v2614_v7 = vor.u32 %v3531_v63, %v2611_v0  ;;  %v3495_v9 = vld [vmem:[#allocation9 + $0xa4] sm:$0xf] }
  0x32   :  { %639 = vmatpush.bf16.msrb.mxu1 %v2646_v47  ;;  %601 = vmatpush.bf16.msra.mxu2 %v2498_v53  ;;  %v3529_v8 = vld [vmem:[#allocation9 + $0x344] sm:$0xf0]  ;;  %v2467_v10 = vld [vmem:[#allocation9 + $0xc8] sm:$0xf0]  ;;  %v3527_v11 = vld [vmem:[#allocation9 + $0x324] sm:$0xf]  ;;  %v2466_v13 = vor.u32 %v3497_v5, %v2465_v4 }
  0x33   :  { %614 = vmatpush.bf16.msra.mxu3 %v2626_v54  ;;  %v2595_v12 = vld [vmem:[#allocation9 + $0x348] sm:$0xf0]  ;;  %v2594_v14 = vor.u32 %v3529_v8, %v2593_v6  ;;  %v2470_v15 = vor.u32 %v3495_v9, %v2467_v10  ;;  %v2449_v16 = vld [vmem:[#allocation9 + $0x50] sm:$0xf]  ;;  %v3493_v17 = vld [vmem:[#allocation9 + $0x74] sm:$0xf0] }
  0x34   :  { %v2577_v18 = vld [vmem:[#allocation9 + $0x2d0] sm:$0xf]  ;;  %v2598_v19 = vor.u32 %v3527_v11, %v2595_v12  ;;  %v3525_v20 = vld [vmem:[#allocation9 + $0x2f4] sm:$0xf0]  ;;  %v3491_v21 = vld [vmem:[#allocation9 + $0x54] sm:$0xf]  ;;  %v2450_v25 = vor.u32 %v3493_v17, %v2449_v16 }
  0x35   :  { %627 = vmatpush.bf16.msrb.mxu0 %v2502_v55  ;;  %v2451_v22 = vld [vmem:[#allocation9 + $0x78] sm:$0xf0]  ;;  %v3523_v23 = vld [vmem:[#allocation9 + $0x2d4] sm:$0xf]  ;;  %v2578_v26 = vor.u32 %v3525_v20, %v2577_v18  ;;  %v2433_v28 = vld [vmem:[#allocation9] sm:$0xf] }
  0x36   :  { %640 = vmatpush.bf16.msrb.mxu1 %v2630_v59  ;;  %602 = vmatpush.bf16.msra.mxu2 %v2482_v1  ;;  %v2579_v24 = vld [vmem:[#allocation9 + $0x2f8] sm:$0xf0]  ;;  %v2454_v27 = vor.u32 %v3491_v21, %v2451_v22  ;;  %v3489_v29 = vld [vmem:[#allocation9 + $0x24] sm:$0xf0]  ;;  %v2561_v31 = vld [vmem:[#allocation9 + $0x280] sm:$0xf] }
  0x37   :  { %615 = vmatpush.bf16.msra.mxu3 %v2610_v2  ;;  %v2582_v30 = vor.u32 %v3523_v23, %v2579_v24  ;;  %v3521_v32 = vld [vmem:[#allocation9 + $0x2a4] sm:$0xf0]  ;;  %v3487_v33 = vld [vmem:[#allocation9 + $0x4] sm:$0xf]  ;;  %v131_v34 = vld [vmem:[#allocation2] sm:$0xff]  ;;  %v2434_v38 = vor.u32 %v3489_v29, %v2433_v28 }
  0x38   :  { %v2435_v35 = vld [vmem:[#allocation9 + $0x28] sm:$0xf0]  ;;  %v3519_v36 = vld [vmem:[#allocation9 + $0x284] sm:$0xf]  ;;  %v2553_v39 = vld [vmem:[#allocation9 + $0x238] sm:$0xf]  ;;  %v2562_v45 = vor.u32 %v3521_v32, %v2561_v31 }
  0x39   :  { %628 = vmatpush.bf16.msrb.mxu0 %v2486_v3  ;;  %v2563_v37 = vld [vmem:[#allocation9 + $0x2a8] sm:$0xf0]  ;;  %v3518_v40 = vld [vmem:[#allocation9 + $0x25c] sm:$0xf0]  ;;  %v2681_v41 = vld [vmem:[#allocation9 + $0x4b8] sm:$0xf]  ;;  %v2438_v46 = vor.u32 %v3487_v33, %v2435_v35 }
  0x3a   :  { %641 = vmatpush.bf16.msrb.mxu1 %v2614_v7  ;;  %603 = vmatpush.bf16.msra.mxu2 %v2466_v13  ;;  %v3550_v42 = vld [vmem:[#allocation9 + $0x4dc] sm:$0xf0]  ;;  %v3516_v43 = vld [vmem:[#allocation9 + $0x23c] sm:$0xf]  ;;  %v2555_v44 = vld [vmem:[#allocation9 + $0x260] sm:$0xf0]  ;;  %v2566_v50 = vor.u32 %v3519_v36, %v2563_v37  ;;  %v2554_v51 = vor.u32 %v3518_v40, %v2553_v39 }
  0x3b   :  { %616 = vmatpush.bf16.msra.mxu3 %v2594_v14  ;;  %v3548_v47 = vld [vmem:[#allocation9 + $0x4bc] sm:$0xf]  ;;  %v2683_v48 = vld [vmem:[#allocation9 + $0x4e0] sm:$0xf0]  ;;  %v2682_v53 = vor.u32 %v3550_v42, %v2681_v41  ;;  %v2558_v54 = vor.u32 %v3516_v43, %v2555_v44  ;;  %v2537_v55 = vld [vmem:[#allocation9 + $0x1e8] sm:$0xf] }
  0x3c   :  { %v3514_v56 = vld [vmem:[#allocation9 + $0x20c] sm:$0xf0]  ;;  %v2665_v57 = vld [vmem:[#allocation9 + $0x468] sm:$0xf]  ;;  %v2686_v58 = vor.u32 %v3548_v47, %v2683_v48  ;;  %v3512_v60 = vld [vmem:[#allocation9 + $0x1ec] sm:$0xf] }
  0x3d   :  { %629 = vmatpush.bf16.msrb.mxu0 %v2470_v15  ;;  %v3546_v59 = vld [vmem:[#allocation9 + $0x48c] sm:$0xf0]  ;;  %v2539_v61 = vld [vmem:[#allocation9 + $0x210] sm:$0xf0]  ;;  %v3544_v62 = vld [vmem:[#allocation9 + $0x46c] sm:$0xf]  ;;  %v2538_v0 = vor.u32 %v3514_v56, %v2537_v55 }
  0x3e   :  { %642 = vmatpush.bf16.msrb.mxu1 %v2598_v19  ;;  %604 = vmatpush.bf16.msra.mxu2 %v2450_v25  ;;  %v2667_v63 = vld [vmem:[#allocation9 + $0x490] sm:$0xf0]  ;;  %v2666_v1 = vor.u32 %v3546_v59, %v2665_v57  ;;  %v2542_v2 = vor.u32 %v3512_v60, %v2539_v61  ;;  %v2521_v4 = vld [vmem:[#allocation9 + $0x198] sm:$0xf]  ;;  %v3510_v5 = vld [vmem:[#allocation9 + $0x1bc] sm:$0xf0] }
  0x3f   :  { %617 = vmatpush.bf16.msra.mxu3 %v2578_v26  ;;  %v2670_v3 = vor.u32 %v3544_v62, %v2667_v63  ;;  %v2522_v6 = vor.u32 %v3510_v5, %v2521_v4  ;;  %v2649_v7 = vld [vmem:[#allocation9 + $0x418] sm:$0xf]  ;;  %v3542_v8 = vld [vmem:[#allocation9 + $0x43c] sm:$0xf0]  ;;  %v3508_v9 = vld [vmem:[#allocation9 + $0x19c] sm:$0xf] }
  0x40   :  { %v2650_v10 = vor.u32 %v3542_v8, %v2649_v7  ;;  %v2523_v11 = vld [vmem:[#allocation9 + $0x1c0] sm:$0xf0]  ;;  %v3540_v12 = vld [vmem:[#allocation9 + $0x41c] sm:$0xf]  ;;  %v2505_v16 = vld [vmem:[#allocation9 + $0x148] sm:$0xf] }
  0x41   :  { %630 = vmatpush.bf16.msrb.mxu0 %v2454_v27  ;;  %v2651_v13 = vld [vmem:[#allocation9 + $0x440] sm:$0xf0]  ;;  %v2526_v14 = vor.u32 %v3508_v9, %v2523_v11  ;;  %v3506_v17 = vld [vmem:[#allocation9 + $0x16c] sm:$0xf0]  ;;  %v2633_v18 = vld [vmem:[#allocation9 + $0x3c8] sm:$0xf] }
  0x42   :  { %643 = vmatpush.bf16.msrb.mxu1 %v2582_v30  ;;  %605 = vmatpush.bf16.msra.mxu2 %v2434_v38  ;;  %v2654_v15 = vor.u32 %v3540_v12, %v2651_v13  ;;  %v2506_v19 = vor.u32 %v3506_v17, %v2505_v16  ;;  %v3538_v20 = vld [vmem:[#allocation9 + $0x3ec] sm:$0xf0]  ;;  %v3504_v21 = vld [vmem:[#allocation9 + $0x14c] sm:$0xf]  ;;  %v2507_v22 = vld [vmem:[#allocation9 + $0x170] sm:$0xf0] }
  0x43   :  { %618 = vmatpush.bf16.msra.mxu3 %v2562_v45  ;;  %v2634_v23 = vor.u32 %v3538_v20, %v2633_v18  ;;  %v2510_v24 = vor.u32 %v3504_v21, %v2507_v22  ;;  %v3536_v25 = vld [vmem:[#allocation9 + $0x3cc] sm:$0xf]  ;;  %v2635_v26 = vld [vmem:[#allocation9 + $0x3f0] sm:$0xf0]  ;;  %v2489_v28 = vld [vmem:[#allocation9 + $0xf8] sm:$0xf] }
  0x44   :  { %v2638_v27 = vor.u32 %v3536_v25, %v2635_v26  ;;  %v3502_v29 = vld [vmem:[#allocation9 + $0x11c] sm:$0xf0]  ;;  %v2617_v30 = vld [vmem:[#allocation9 + $0x378] sm:$0xf]  ;;  %v3500_v33 = vld [vmem:[#allocation9 + $0xfc] sm:$0xf] }
  0x45   :  { %631 = vmatpush.bf16.msrb.mxu0 %v2438_v46  ;;  %v2490_v31 = vor.u32 %v3502_v29, %v2489_v28  ;;  %v3534_v32 = vld [vmem:[#allocation9 + $0x39c] sm:$0xf0]  ;;  %v3532_v37 = vld [vmem:[#allocation9 + $0x37c] sm:$0xf]  ;;  %v2619_v38 = vld [vmem:[#allocation9 + $0x3a0] sm:$0xf0] }
  0x46   :  { %644 = vmatpush.bf16.msrb.mxu1 %v2566_v50  ;;  %650 = vmatpush.bf16.msrb.mxu2 %v2554_v51  ;;  %v2618_v35 = vor.u32 %v3534_v32, %v2617_v30  ;;  %v2473_v39 = vld [vmem:[#allocation9 + $0xa8] sm:$0xf]  ;;  %v2622_v40 = vor.u32 %v3532_v37, %v2619_v38  ;;  %v3498_v41 = vld [vmem:[#allocation9 + $0xcc] sm:$0xf0]  ;;  %v3496_v46 = vld [vmem:[#allocation9 + $0xac] sm:$0xf] }
  0x47   :  { %663 = vmatpush.bf16.msrb.mxu3 %v2682_v53  ;;  %v2601_v42 = vld [vmem:[#allocation9 + $0x328] sm:$0xf]  ;;  %v3530_v43 = vld [vmem:[#allocation9 + $0x34c] sm:$0xf0]  ;;  %v2474_v44 = vor.u32 %v3498_v41, %v2473_v39  ;;  %v2475_v47 = vld [vmem:[#allocation9 + $0xd0] sm:$0xf0] }
  0x48   :  { %v2602_v45 = vor.u32 %v3530_v43, %v2601_v42  ;;  %v3528_v48 = vld [vmem:[#allocation9 + $0x32c] sm:$0xf]  ;;  %v2603_v50 = vld [vmem:[#allocation9 + $0x350] sm:$0xf0]  ;;  %v2457_v51 = vld [vmem:[#allocation9 + $0x58] sm:$0xf] }
  0x49   :  { %v2606_v53 = vor.u32 %v3528_v48, %v2603_v50  ;;  %v3526_v55 = vld [vmem:[#allocation9 + $0x2fc] sm:$0xf0]  ;;  %v3492_v56 = vld [vmem:[#allocation9 + $0x5c] sm:$0xf]  ;;  %v2587_v60 = vld [vmem:[#allocation9 + $0x300] sm:$0xf0] }
  0x4a   :  { %651 = vmatpush.bf16.msrb.mxu2 %v2538_v0  ;;  %v3524_v59 = vld [vmem:[#allocation9 + $0x2dc] sm:$0xf]  ;;  %v2441_v63 = vld [vmem:[#allocation9 + $0x8] sm:$0xf]  ;;  %v3490_v0 = vld [vmem:[#allocation9 + $0x2c] sm:$0xf0] }
  0x4b   :  { %664 = vmatpush.bf16.msrb.mxu3 %v2666_v1  ;;  %v2569_v1 = vld [vmem:[#allocation9 + $0x288] sm:$0xf]  ;;  %v3488_v4 = vld [vmem:[#allocation9 + $0xc] sm:$0xf]  ;;  %v2443_v5 = vld [vmem:[#allocation9 + $0x30] sm:$0xf0]  ;;  %v2442_v8 = vor.u32 %v3490_v0, %v2441_v63 }
  0x4c   :  { %v2571_v7 = vld [vmem:[#allocation9 + $0x2b0] sm:$0xf0]  ;;  %v147_v12 = vld [vmem:[#allocation12] ss:$8 sm:$0x3] }
  0x4d   :  { %v149_v13 = vperm.slane %v147_v12, 0  ;;  %v3582_v22 = vld [vmem:[#allocation10 + $0xf4] sm:$0xf0]  ;;  %v2937_v25 = vld [vmem:[#allocation10 + $0x1f0] sm:$0xf] }
  0x4e   :  { %652 = vmatpush.bf16.msrb.mxu2 %v2522_v6  ;;  %v3520_v6 = vld [vmem:[#allocation9 + $0x28c] sm:$0xf]  ;;  %v3614_v28 = vld [vmem:[#allocation10 + $0x1f4] sm:$0xf0]  ;;  %v2873_v29 = vld [vmem:[#allocation10 + $0x170] sm:$0xf] }
  0x4f   :  { %665 = vmatpush.bf16.msrb.mxu3 %v2650_v10  ;;  %v2446_v10 = vor.u32 %v3488_v4, %v2443_v5  ;;  %v2574_v11 = vor.u32 %v3520_v6, %v2571_v7  ;;  %v3598_v30 = vld [vmem:[#allocation10 + $0x174] sm:$0xf0]  ;;  %v2737_v37 = vld [vmem:[#allocation10 + $0x60] sm:$0xf]  ;;  %v3564_v38 = vld [vmem:[#allocation10 + $0x64] sm:$0xf0]  ;;  %v2938_v39 = vor.u32 %v3614_v28, %v2937_v25 }
  0x50   :  { %v2874_v41 = vor.u32 %v3598_v30, %v2873_v29  ;;  %v3612_v42 = vld [vmem:[#allocation10 + $0x1e4] sm:$0xf0]  ;;  %v2865_v43 = vld [vmem:[#allocation10 + $0x160] sm:$0xf]  ;;  %v2738_v48 = vor.u32 %v3564_v38, %v2737_v37  ;;  %v3562_v50 = vld [vmem:[#allocation10 + $0x54] sm:$0xf0] }
  0x51   :  { %v2777_v4 = vld [vmem:[#allocation10 + $0xb0] sm:$0xf]  ;;  %v3574_v6 = vld [vmem:[#allocation10 + $0xb4] sm:$0xf0]  ;;  %v3568_v28 = vld [vmem:[#allocation10 + $0x84] sm:$0xf0] }
  0x52   :  { %653 = vmatpush.bf16.msrb.mxu2 %v2506_v19  ;;  %v2809_v19 = vld [vmem:[#allocation10 + $0xf0] sm:$0xf]  ;;  %v3581_v29 = vld [vmem:[#allocation10 + $0xf4] sm:$0xf]  ;;  %v2811_v30 = vld [vmem:[#allocation10 + $0xf8] sm:$0xf0] }
  0x53   :  { %666 = vmatpush.bf16.msrb.mxu3 %v2634_v23  ;;  %v2745_v23 = vld [vmem:[#allocation10 + $0x70] sm:$0xf]  ;;  %v3552_v37 = vld [vmem:[#allocation10 + $0x4] sm:$0xf0]  ;;  %v2849_v38 = vld [vmem:[#allocation10 + $0x140] sm:$0xf] }
  0x54   :  { %v2713_v7 = vld [vmem:[#allocation10 + $0x30] sm:$0xf] }
  0x56   :  { %654 = vmatpush.bf16.msrb.mxu2 %v2490_v31 }
  0x57   :  { %667 = vmatpush.bf16.msrb.mxu3 %v2618_v35  ;;  %v3580_v35 = vld [vmem:[#allocation10 + $0xe4] sm:$0xf0] }
  0x5a   :  { %655 = vmatpush.bf16.msrb.mxu2 %v2474_v44  ;;  %v3596_v44 = vld [vmem:[#allocation10 + $0x164] sm:$0xf0] }
  0x5b   :  { %668 = vmatpush.bf16.msrb.mxu3 %v2602_v45 }
  0x93   :  { %v135_v49 = vpop.permute.xlu0 %134 }
  0x94   :  { %v138_v52 = vsel %vm137_vm0, %v131_v34, %v135_v49  ;;  %v2491_v34 = vld [vmem:[#allocation9 + $0x120] sm:$0xf0]  ;;  %v2478_v49 = vor.u32 %v3496_v46, %v2475_v47  ;;  %v2793_v46 = vld [vmem:[#allocation10 + $0xd0] sm:$0xf]  ;;  %v3578_v47 = vld [vmem:[#allocation10 + $0xd4] sm:$0xf0] }
  0x95   :  { %2429 = vmatmul.msk.f32.vlgmr.msra.gmra.mxu0 %vm153_vm1, %v138_v52  ;;  %2430 = vmatmul.msk.f32.vlgmr.msra.gmra.mxu1 %vm153_vm1, %v138_v52  ;;  %v2494_v36 = vor.u32 %v3500_v33, %v2491_v34  ;;  %v3494_v52 = vld [vmem:[#allocation9 + $0x7c] sm:$0xf0]  ;;  %v2810_v33 = vor.u32 %v3582_v22, %v2809_v19  ;;  %v3570_v22 = vld [vmem:[#allocation10 + $0x94] sm:$0xf0] }
  0x96   :  { %676 = vmatpush.bf16.msra.mxu0 %v2558_v54  ;;  %689 = vmatpush.bf16.msra.mxu1 %v2686_v58  ;;  %v2585_v54 = vld [vmem:[#allocation9 + $0x2d8] sm:$0xf]  ;;  %v2458_v57 = vor.u32 %v3494_v52, %v2457_v51  ;;  %v2459_v58 = vld [vmem:[#allocation9 + $0x80] sm:$0xf0]  ;;  %v2801_v34 = vld [vmem:[#allocation10 + $0xe0] sm:$0xf] }
  0x97   :  { %v2586_v61 = vor.u32 %v3526_v55, %v2585_v54  ;;  %v2462_v62 = vor.u32 %v3492_v56, %v2459_v58  ;;  %v2802_v45 = vor.u32 %v3580_v35, %v2801_v34  ;;  %v2921_v52 = vld [vmem:[#allocation10 + $0x1d0] sm:$0xf]  ;;  %v3610_v54 = vld [vmem:[#allocation10 + $0x1d4] sm:$0xf0]  ;;  %v2785_v58 = vld [vmem:[#allocation10 + $0xc0] sm:$0xf] }
  0x98   :  { %656 = vmatpush.bf16.msrb.mxu2 %v2458_v57  ;;  %v2857_v55 = vld [vmem:[#allocation10 + $0x150] sm:$0xf]  ;;  %v3594_v56 = vld [vmem:[#allocation10 + $0x154] sm:$0xf0]  ;;  %v2794_v57 = vor.u32 %v3578_v47, %v2793_v46  ;;  %v2922_v63 = vor.u32 %v3610_v54, %v2921_v52  ;;  %v2803_v34 = vld [vmem:[#allocation10 + $0xe8] sm:$0xf0] }
  0x99   :  { %669 = vmatpush.bf16.msrb.mxu3 %v2586_v61  ;;  %v2721_v61 = vld [vmem:[#allocation10 + $0x40] sm:$0xf]  ;;  %v2858_v0 = vor.u32 %v3594_v56, %v2857_v55  ;;  %v3604_v46 = vld [vmem:[#allocation10 + $0x1a4] sm:$0xf0]  ;;  %v3590_v52 = vld [vmem:[#allocation10 + $0x134] sm:$0xf0] }
  0x9a   :  { %677 = vmatpush.bf16.msra.mxu0 %v2542_v2  ;;  %690 = vmatpush.bf16.msra.mxu1 %v2670_v3  ;;  %v2590_v2 = vor.u32 %v3524_v59, %v2587_v60  ;;  %v3522_v3 = vld [vmem:[#allocation9 + $0x2ac] sm:$0xf0]  ;;  %v3576_v60 = vld [vmem:[#allocation10 + $0xc4] sm:$0xf0]  ;;  %v3563_v54 = vld [vmem:[#allocation10 + $0x64] sm:$0xf] }
  0x9b   :  { %v2570_v9 = vor.u32 %v3522_v3, %v2569_v1  ;;  %v2913_v1 = vld [vmem:[#allocation10 + $0x1c0] sm:$0xf]  ;;  %v2786_v3 = vor.u32 %v3576_v60, %v2785_v58  ;;  %v2739_v55 = vld [vmem:[#allocation10 + $0x68] sm:$0xf0]  ;;  %v3602_v58 = vld [vmem:[#allocation10 + $0x194] sm:$0xf0] }
  0x9c   :  { %657 = vmatpush.bf16.msrb.mxu2 %v2442_v8  ;;  %v3558_v8 = vld [vmem:[#allocation10 + $0x34] sm:$0xf0]  ;;  %v2742_v56 = vor.u32 %v3563_v54, %v2739_v55  ;;  %v3575_v60 = vld [vmem:[#allocation10 + $0xc4] sm:$0xf]  ;;  %v2699_v54 = vld [vmem:[#allocation10 + $0x18] sm:$0xf0] }
  0x9d   :  { %670 = vmatpush.bf16.msrb.mxu3 %v2570_v9  ;;  %v3593_v55 = vld [vmem:[#allocation10 + $0x154] sm:$0xf] }
  0x9e   :  { %678 = vmatpush.bf16.msra.mxu0 %v2526_v14  ;;  %691 = vmatpush.bf16.msra.mxu1 %v2654_v15  ;;  %v150_v14 = vperm.slane %v147_v12, 1  ;;  %v2778_v12 = vor.u32 %v3574_v6, %v2777_v4  ;;  %v3600_v6 = vld [vmem:[#allocation10 + $0x184] sm:$0xf0] }
  0xa2   :  { %679 = vmatpush.bf16.msra.mxu0 %v2510_v24  ;;  %692 = vmatpush.bf16.msra.mxu1 %v2638_v27  ;;  %v3566_v24 = vld [vmem:[#allocation10 + $0x74] sm:$0xf0] }
  0xa6   :  { %680 = vmatpush.bf16.msra.mxu0 %v2494_v36  ;;  %693 = vmatpush.bf16.msra.mxu1 %v2622_v40  ;;  %v2746_v36 = vor.u32 %v3566_v24, %v2745_v23  ;;  %v2929_v40 = vld [vmem:[#allocation10 + $0x1e0] sm:$0xf]  ;;  %v2697_v23 = vld [vmem:[#allocation10 + $0x10] sm:$0xf]  ;;  %v3554_v24 = vld [vmem:[#allocation10 + $0x14] sm:$0xf0] }
  0xa7   :  { %v2930_v51 = vor.u32 %v3612_v42, %v2929_v40  ;;  %v3592_v40 = vld [vmem:[#allocation10 + $0x144] sm:$0xf0]  ;;  %v2747_v42 = vld [vmem:[#allocation10 + $0x78] sm:$0xf0] }
  0xaa   :  { %681 = vmatpush.bf16.msra.mxu0 %v2478_v49  ;;  %694 = vmatpush.bf16.msra.mxu1 %v2606_v53  ;;  %v2729_v49 = vld [vmem:[#allocation10 + $0x50] sm:$0xf]  ;;  %v2866_v53 = vor.u32 %v3596_v44, %v2865_v43  ;;  %v2850_v43 = vor.u32 %v3592_v40, %v2849_v38 }
  0xab   :  { %v2730_v59 = vor.u32 %v3562_v50, %v2729_v49  ;;  %v2795_v49 = vld [vmem:[#allocation10 + $0xd8] sm:$0xf0] }
  0xae   :  { %682 = vmatpush.bf16.msra.mxu0 %v2462_v62  ;;  %695 = vmatpush.bf16.msra.mxu1 %v2590_v2  ;;  %v3560_v62 = vld [vmem:[#allocation10 + $0x44] sm:$0xf0] }
  0xaf   :  { %v3608_v2 = vld [vmem:[#allocation10 + $0x1c4] sm:$0xf0]  ;;  %v2722_v5 = vor.u32 %v3560_v62, %v2721_v61  ;;  %v2787_v61 = vld [vmem:[#allocation10 + $0xc8] sm:$0xf0] }
  0xb0   :  { %v2914_v9 = vor.u32 %v3608_v2, %v2913_v1  ;;  %v2790_v62 = vor.u32 %v3575_v60, %v2787_v61  ;;  %v3561_v2 = vld [vmem:[#allocation10 + $0x54] sm:$0xf]  ;;  %v2907_v60 = vld [vmem:[#allocation10 + $0x1b8] sm:$0xf0] }
  0xb1   :  { %v4037_v61 = vld [vmem:[#allocation12 + $0x1] ss:$8 sm:$0xf] }
  0xb2   :  { %683 = vmatpush.bf16.msra.mxu0 %v2446_v10  ;;  %696 = vmatpush.bf16.msra.mxu1 %v2574_v11  ;;  %v2905_v10 = vld [vmem:[#allocation10 + $0x1b0] sm:$0xf]  ;;  %v3606_v11 = vld [vmem:[#allocation10 + $0x1b4] sm:$0xf0] }
 0x112   :  { %v174_v15 = vpop.f32.mrf.mxu0  ;;  %v194_v16 = vpop.f32.mrf.mxu1 }
 0x113   :  { %v175_v17 = vadd.f32 %v174_v15, %v149_v13  ;;  %v195_v18 = vadd.f32 %v194_v16, %v150_v14  ;;  %v2769_v13 = vld [vmem:[#allocation10 + $0xa0] sm:$0xf]  ;;  %v2714_v14 = vor.u32 %v3558_v8, %v2713_v7  ;;  %v3572_v15 = vld [vmem:[#allocation10 + $0xa4] sm:$0xf0]  ;;  %v3573_v8 = vld [vmem:[#allocation10 + $0xb4] sm:$0xf] }
 0x114   :  { %v2705_v16 = vld [vmem:[#allocation10 + $0x20] sm:$0xf]  ;;  %v2770_v19 = vor.u32 %v3572_v15, %v2769_v13  ;;  %v2825_v13 = vld [vmem:[#allocation10 + $0x110] sm:$0xf] }
 0x115   :  { %v197_v20 = vmul.f32 0.01, %v175_v17  ;;  %v198_v21 = vmul.f32 0.01, %v195_v18 }
 0x117   :  { %v199_v26 = vmax.f32 %v175_v17, %v197_v20  ;;  %v200_v27 = vmax.f32 %v195_v18, %v198_v21  ;;  %v3556_v17 = vld [vmem:[#allocation10 + $0x24] sm:$0xf0]  ;;  %v2906_v18 = vor.u32 %v3606_v11, %v2905_v10  ;;  %v2761_v20 = vld [vmem:[#allocation10 + $0x90] sm:$0xf]  ;;  %v3613_v10 = vld [vmem:[#allocation10 + $0x1f4] sm:$0xf] }
 0x118   :  { %v2706_v21 = vor.u32 %v3556_v17, %v2705_v16  ;;  %v2762_v25 = vor.u32 %v3570_v22, %v2761_v20  ;;  %v3559_v17 = vld [vmem:[#allocation10 + $0x44] sm:$0xf] }
 0x119   :  { %v4025_v31 = vpack.c.bf16 %v199_v26, %v199_v26  ;;  %v4027_v32 = vpack.c.bf16 %v200_v27, %v200_v27  ;;  %v2698_v26 = vor.u32 %v3554_v24, %v2697_v23  ;;  %v2753_v27 = vld [vmem:[#allocation10 + $0x80] sm:$0xf]  ;;  %v3571_v20 = vld [vmem:[#allocation10 + $0xa4] sm:$0xf]  ;;  %v2931_v24 = vld [vmem:[#allocation10 + $0x1e8] sm:$0xf0] }
 0x11a   :  { %v3611_v22 = vld [vmem:[#allocation10 + $0x1e4] sm:$0xf] }
 0x11b   :  { %606 = vmatmul.bf16.vlgmr.msra.gmra.mxu2 %v4025_v31  ;;  %619 = vmatmul.bf16.vlgmr.msra.gmra.mxu3 %v4027_v32 }
 0x11c   :  { %632 = vmatmul.bf16.vlgmr.msrb.gmra.mxu0 %v4025_v31  ;;  %645 = vmatmul.bf16.vlgmr.msrb.gmra.mxu1 %v4027_v32 }
 0x11d   :  { %1118 = vmatpush.bf16.msra.mxu3 %v2810_v33  ;;  %1105 = vmatpush.bf16.msra.mxu2 %v2746_v36  ;;  %v3579_v33 = vld [vmem:[#allocation10 + $0xe4] sm:$0xf]  ;;  %v2689_v36 = vld [vmem:[#allocation10] sm:$0xf] }
 0x11e   :  { %1144 = vmatpush.bf16.msrb.mxu1 %v2938_v39  ;;  %1131 = vmatpush.bf16.msrb.mxu0 %v2874_v41  ;;  %v2806_v35 = vor.u32 %v3579_v33, %v2803_v34  ;;  %v2690_v39 = vor.u32 %v3552_v37, %v2689_v36  ;;  %v3565_v41 = vld [vmem:[#allocation10 + $0x74] sm:$0xf]  ;;  %v2875_v33 = vld [vmem:[#allocation10 + $0x178] sm:$0xf0] }
 0x11f   :  { %v2750_v44 = vor.u32 %v3565_v41, %v2747_v42  ;;  %v2763_v36 = vld [vmem:[#allocation10 + $0x98] sm:$0xf0]  ;;  %v3609_v37 = vld [vmem:[#allocation10 + $0x1d4] sm:$0xf]  ;;  %v3555_v41 = vld [vmem:[#allocation10 + $0x24] sm:$0xf] }
 0x120   :  { %v2707_v42 = vld [vmem:[#allocation10 + $0x28] sm:$0xf0] }
 0x121   :  { %1119 = vmatpush.bf16.msra.mxu3 %v2802_v45  ;;  %1106 = vmatpush.bf16.msra.mxu2 %v2738_v48  ;;  %v2897_v45 = vld [vmem:[#allocation10 + $0x1a0] sm:$0xf]  ;;  %v3577_v48 = vld [vmem:[#allocation10 + $0xd4] sm:$0xf] }
 0x122   :  { %1145 = vmatpush.bf16.msrb.mxu1 %v2930_v51  ;;  %1132 = vmatpush.bf16.msrb.mxu0 %v2866_v53  ;;  %v2898_v47 = vor.u32 %v3604_v46, %v2897_v45  ;;  %v2798_v50 = vor.u32 %v3577_v48, %v2795_v49  ;;  %v2841_v51 = vld [vmem:[#allocation10 + $0x130] sm:$0xf]  ;;  %v2867_v45 = vld [vmem:[#allocation10 + $0x168] sm:$0xf0] }
 0x123   :  { %v2842_v53 = vor.u32 %v3590_v52, %v2841_v51  ;;  %v2755_v48 = vld [vmem:[#allocation10 + $0x88] sm:$0xf0] }
 0x124   :  { %v2915_v51 = vld [vmem:[#allocation10 + $0x1c8] sm:$0xf0] }
 0x125   :  { %1120 = vmatpush.bf16.msra.mxu3 %v2794_v57  ;;  %1107 = vmatpush.bf16.msra.mxu2 %v2730_v59  ;;  %v2889_v57 = vld [vmem:[#allocation10 + $0x190] sm:$0xf] }
 0x126   :  { %1146 = vmatpush.bf16.msrb.mxu1 %v2922_v63  ;;  %1133 = vmatpush.bf16.msrb.mxu0 %v2858_v0  ;;  %v2890_v59 = vor.u32 %v3602_v58, %v2889_v57  ;;  %v2833_v63 = vld [vmem:[#allocation10 + $0x120] sm:$0xf]  ;;  %v3588_v0 = vld [vmem:[#allocation10 + $0x124] sm:$0xf0]  ;;  %v2859_v57 = vld [vmem:[#allocation10 + $0x158] sm:$0xf0] }
 0x127   :  { %v2834_v1 = vor.u32 %v3588_v0, %v2833_v63  ;;  %v2862_v58 = vor.u32 %v3593_v55, %v2859_v57  ;;  %v3551_v63 = vld [vmem:[#allocation10 + $0x4] sm:$0xf]  ;;  %v2691_v0 = vld [vmem:[#allocation10 + $0x8] sm:$0xf0] }
 0x129   :  { %1121 = vmatpush.bf16.msra.mxu3 %v2786_v3  ;;  %1108 = vmatpush.bf16.msra.mxu2 %v2722_v5  ;;  %v2731_v3 = vld [vmem:[#allocation10 + $0x58] sm:$0xf0]  ;;  %v2881_v5 = vld [vmem:[#allocation10 + $0x180] sm:$0xf] }
 0x12a   :  { %1147 = vmatpush.bf16.msrb.mxu1 %v2914_v9  ;;  %1134 = vmatpush.bf16.msrb.mxu0 %v2850_v43  ;;  %v2734_v4 = vor.u32 %v3561_v2, %v2731_v3  ;;  %v2882_v7 = vor.u32 %v3600_v6, %v2881_v5  ;;  %v2779_v9 = vld [vmem:[#allocation10 + $0xb8] sm:$0xf0]  ;;  %v3595_v43 = vld [vmem:[#allocation10 + $0x164] sm:$0xf]  ;;  %v2694_v2 = vor.u32 %v3551_v63, %v2691_v0  ;;  %v2851_v3 = vld [vmem:[#allocation10 + $0x148] sm:$0xf0] }
 0x12b   :  { %658 = vmatmul.bf16.vlgmr.msrb.gmra.mxu2 %v4025_v31  ;;  %671 = vmatmul.bf16.vlgmr.msrb.gmra.mxu3 %v4027_v32  ;;  %v2782_v11 = vor.u32 %v3573_v8, %v2779_v9  ;;  %v2870_v46 = vor.u32 %v3595_v43, %v2867_v45  ;;  %v3603_v6 = vld [vmem:[#allocation10 + $0x1a4] sm:$0xf]  ;;  %v3589_v9 = vld [vmem:[#allocation10 + $0x134] sm:$0xf]  ;;  %v273_v45 = vperm.slane %v4037_v61, 3 }
 0x12c   :  { %684 = vmatmul.bf16.vlgmr.msra.gmra.mxu0 %v4025_v31  ;;  %697 = vmatmul.bf16.vlgmr.msra.gmra.mxu1 %v4027_v32  ;;  %v2754_v31 = vor.u32 %v3568_v28, %v2753_v27  ;;  %v2814_v32 = vor.u32 %v3581_v29, %v2811_v30  ;;  %v3584_v27 = vld [vmem:[#allocation10 + $0x104] sm:$0xf0]  ;;  %v3557_v28 = vld [vmem:[#allocation10 + $0x34] sm:$0xf]  ;;  %v2715_v29 = vld [vmem:[#allocation10 + $0x38] sm:$0xf0] }
 0x12d   :  { %1122 = vmatpush.bf16.msra.mxu3 %v2778_v12  ;;  %1109 = vmatpush.bf16.msra.mxu2 %v2714_v14  ;;  %v2939_v12 = vld [vmem:[#allocation10 + $0x1f8] sm:$0xf0]  ;;  %v3586_v14 = vld [vmem:[#allocation10 + $0x114] sm:$0xf0] }
 0x12e   :  { %1148 = vmatpush.bf16.msrb.mxu1 %v2906_v18  ;;  %1135 = vmatpush.bf16.msrb.mxu0 %v2842_v53  ;;  %v2942_v15 = vor.u32 %v3613_v10, %v2939_v12  ;;  %v2826_v16 = vor.u32 %v3586_v14, %v2825_v13  ;;  %v2723_v18 = vld [vmem:[#allocation10 + $0x48] sm:$0xf0]  ;;  %v3553_v53 = vld [vmem:[#allocation10 + $0x14] sm:$0xf]  ;;  %v2843_v10 = vld [vmem:[#allocation10 + $0x138] sm:$0xf0] }
 0x12f   :  { %v2846_v13 = vor.u32 %v3589_v9, %v2843_v10  ;;  %v3601_v14 = vld [vmem:[#allocation10 + $0x194] sm:$0xf]  ;;  %v3628_v9 = vld [vmem:[#allocation9 + $0x214] sm:$0xf0] }
 0x130   :  { %v3627_v10 = vld [vmem:[#allocation9 + $0x1f4] sm:$0xf] }
 0x131   :  { %1123 = vmatpush.bf16.msra.mxu3 %v2770_v19  ;;  %1110 = vmatpush.bf16.msra.mxu2 %v2706_v21  ;;  %v2726_v19 = vor.u32 %v3559_v17, %v2723_v18  ;;  %v2771_v21 = vld [vmem:[#allocation10 + $0xa8] sm:$0xf0] }
 0x132   :  { %1149 = vmatpush.bf16.msrb.mxu1 %v2898_v47  ;;  %1136 = vmatpush.bf16.msrb.mxu0 %v2834_v1  ;;  %v2774_v23 = vor.u32 %v3571_v20, %v2771_v21  ;;  %v3567_v47 = vld [vmem:[#allocation10 + $0x84] sm:$0xf]  ;;  %v270_v20 = vperm.slane %v4037_v61, 0 }
 0x133   :  { %v2758_v49 = vor.u32 %v3567_v47, %v2755_v48  ;;  %v3591_v1 = vld [vmem:[#allocation10 + $0x144] sm:$0xf] }
 0x134   :  { %v2854_v5 = vor.u32 %v3591_v1, %v2851_v3  ;;  %v3599_v21 = vld [vmem:[#allocation10 + $0x184] sm:$0xf]  ;;  %v3003_v3 = vld [vmem:[#allocation9 + $0x268] sm:$0xf0] }
 0x135   :  { %1124 = vmatpush.bf16.msra.mxu3 %v2762_v25  ;;  %1111 = vmatpush.bf16.msra.mxu2 %v2698_v26  ;;  %v2817_v25 = vld [vmem:[#allocation10 + $0x100] sm:$0xf]  ;;  %v2934_v26 = vor.u32 %v3611_v22, %v2931_v24  ;;  %v2883_v22 = vld [vmem:[#allocation10 + $0x188] sm:$0xf0] }
 0x136   :  { %1150 = vmatpush.bf16.msrb.mxu1 %v2890_v59  ;;  %1137 = vmatpush.bf16.msrb.mxu0 %v2826_v16  ;;  %v2818_v30 = vor.u32 %v3584_v27, %v2817_v25  ;;  %v3605_v59 = vld [vmem:[#allocation10 + $0x1b4] sm:$0xf]  ;;  %v3587_v16 = vld [vmem:[#allocation10 + $0x124] sm:$0xf] }
 0x137   :  { %v3585_v25 = vld [vmem:[#allocation10 + $0x114] sm:$0xf] }
 0x139   :  { %1125 = vmatpush.bf16.msra.mxu3 %v2754_v31  ;;  %1112 = vmatpush.bf16.msra.mxu2 %v2690_v39  ;;  %v2718_v31 = vor.u32 %v3557_v28, %v2715_v29  ;;  %v2923_v39 = vld [vmem:[#allocation10 + $0x1d8] sm:$0xf0] }
 0x13a   :  { %1151 = vmatpush.bf16.msrb.mxu1 %v2882_v7  ;;  %1138 = vmatpush.bf16.msrb.mxu0 %v2818_v30  ;;  %v2926_v40 = vor.u32 %v3609_v37, %v2923_v39  ;;  %v2899_v7 = vld [vmem:[#allocation10 + $0x1a8] sm:$0xf0]  ;;  %v2886_v30 = vor.u32 %v3599_v21, %v2883_v22  ;;  %v3583_v39 = vld [vmem:[#allocation10 + $0x104] sm:$0xf]  ;;  %v3624_v21 = vld [vmem:[#allocation9 + $0x174] sm:$0xf0] }
 0x13b   :  { %v2902_v8 = vor.u32 %v3603_v6, %v2899_v7  ;;  %v3623_v22 = vld [vmem:[#allocation9 + $0x154] sm:$0xf] }
 0x13d   :  { %1170 = vmatpush.bf16.msrb.mxu3 %v2814_v32  ;;  %1157 = vmatpush.bf16.msrb.mxu2 %v2750_v44  ;;  %v3597_v32 = vld [vmem:[#allocation10 + $0x174] sm:$0xf]  ;;  %v2710_v44 = vor.u32 %v3555_v41, %v2707_v42 }
 0x13e   :  { %1196 = vmatpush.bf16.msra.mxu1 %v2942_v15  ;;  %v2878_v34 = vor.u32 %v3597_v32, %v2875_v33  ;;  %v2891_v15 = vld [vmem:[#allocation10 + $0x198] sm:$0xf0] }
 0x13f   :  { %v2894_v18 = vor.u32 %v3601_v14, %v2891_v15  ;;  %v2985_v14 = vld [vmem:[#allocation9 + $0x1a0] sm:$0xf]  ;;  %v3626_v15 = vld [vmem:[#allocation9 + $0x1c4] sm:$0xf0] }
 0x140   :  { %1183 = vmatpush.bf16.msra.mxu0 %v2878_v34 }
 0x141   :  { %1171 = vmatpush.bf16.msrb.mxu3 %v2806_v35  ;;  %1158 = vmatpush.bf16.msrb.mxu2 %v2742_v56  ;;  %v3569_v35 = vld [vmem:[#allocation10 + $0x94] sm:$0xf]  ;;  %v2702_v56 = vor.u32 %v3553_v53, %v2699_v54  ;;  %v272_v53 = vperm.slane %v4037_v61, 2 }
 0x142   :  { %1197 = vmatpush.bf16.msra.mxu1 %v2934_v26  ;;  %v2766_v38 = vor.u32 %v3569_v35, %v2763_v36  ;;  %v2827_v26 = vld [vmem:[#allocation10 + $0x118] sm:$0xf0] }
 0x143   :  { %v2830_v33 = vor.u32 %v3585_v25, %v2827_v26  ;;  %v2969_v26 = vld [vmem:[#allocation9 + $0x100] sm:$0xf] }
 0x144   :  { %1184 = vmatpush.bf16.msra.mxu0 %v2870_v46 }
 0x145   :  { %1172 = vmatpush.bf16.msrb.mxu3 %v2798_v50  ;;  %1159 = vmatpush.bf16.msrb.mxu2 %v2734_v4  ;;  %v3607_v50 = vld [vmem:[#allocation10 + $0x1c4] sm:$0xf]  ;;  %v271_v4 = vperm.slane %v4037_v61, 1 }
 0x146   :  { %1198 = vmatpush.bf16.msra.mxu1 %v2926_v40  ;;  %v2918_v52 = vor.u32 %v3607_v50, %v2915_v51  ;;  %v2819_v40 = vld [vmem:[#allocation10 + $0x108] sm:$0xf0]  ;;  %v3630_v50 = vld [vmem:[#allocation9 + $0x264] sm:$0xf0] }
 0x147   :  { %v2822_v42 = vor.u32 %v3583_v39, %v2819_v40  ;;  %v3620_v39 = vld [vmem:[#allocation9 + $0xd4] sm:$0xf0]  ;;  %v3057_v40 = vld [vmem:[#allocation9 + $0x470] sm:$0xf] }
 0x148   :  { %1185 = vmatpush.bf16.msra.mxu0 %v2862_v58 }
 0x149   :  { %1173 = vmatpush.bf16.msrb.mxu3 %v2790_v62  ;;  %1160 = vmatpush.bf16.msrb.mxu2 %v2726_v19  ;;  %v2910_v62 = vor.u32 %v3605_v59, %v2907_v60  ;;  %v2835_v19 = vld [vmem:[#allocation10 + $0x128] sm:$0xf0] }
 0x14a   :  { %1199 = vmatpush.bf16.msra.mxu1 %v2918_v52  ;;  %v2838_v24 = vor.u32 %v3587_v16, %v2835_v19  ;;  %v3625_v16 = vld [vmem:[#allocation9 + $0x1a4] sm:$0xf] }
 0x14c   :  { %1186 = vmatpush.bf16.msra.mxu0 %v2854_v5 }
 0x14d   :  { %1174 = vmatpush.bf16.msrb.mxu3 %v2782_v11  ;;  %1161 = vmatpush.bf16.msrb.mxu2 %v2718_v31 }
 0x14e   :  { %1200 = vmatpush.bf16.msra.mxu1 %v2910_v62 }
 0x150   :  { %1187 = vmatpush.bf16.msra.mxu0 %v2846_v13 }
 0x151   :  { %1175 = vmatpush.bf16.msrb.mxu3 %v2774_v23  ;;  %1162 = vmatpush.bf16.msrb.mxu2 %v2710_v44 }
 0x152   :  { %1201 = vmatpush.bf16.msra.mxu1 %v2902_v8  ;;  %v2993_v8 = vld [vmem:[#allocation9 + $0x1f0] sm:$0xf] }
 0x154   :  { %1188 = vmatpush.bf16.msra.mxu0 %v2838_v24  ;;  %v2979_v24 = vld [vmem:[#allocation9 + $0x178] sm:$0xf0] }
 0x155   :  { %1176 = vmatpush.bf16.msrb.mxu3 %v2766_v38  ;;  %1163 = vmatpush.bf16.msrb.mxu2 %v2702_v56  ;;  %v2982_v25 = vor.u32 %v3623_v22, %v2979_v24  ;;  %v3634_v24 = vld [vmem:[#allocation9 + $0x304] sm:$0xf0] }
 0x156   :  { %1202 = vmatpush.bf16.msra.mxu1 %v2894_v18  ;;  %v2987_v18 = vld [vmem:[#allocation9 + $0x1c8] sm:$0xf0] }
 0x157   :  { %v2990_v19 = vor.u32 %v3625_v16, %v2987_v18  ;;  %v3025_v16 = vld [vmem:[#allocation9 + $0x330] sm:$0xf]  ;;  %v3635_v18 = vld [vmem:[#allocation9 + $0x334] sm:$0xf] }
 0x158   :  { %1189 = vmatpush.bf16.msra.mxu0 %v2830_v33 }
 0x159   :  { %1177 = vmatpush.bf16.msrb.mxu3 %v2758_v49  ;;  %1164 = vmatpush.bf16.msrb.mxu2 %v2694_v2  ;;  %v3001_v49 = vld [vmem:[#allocation9 + $0x240] sm:$0xf]  ;;  %v3629_v2 = vld [vmem:[#allocation9 + $0x244] sm:$0xf] }
 0x15a   :  { %1203 = vmatpush.bf16.msra.mxu1 %v2886_v30  ;;  %v3002_v52 = vor.u32 %v3630_v50, %v3001_v49  ;;  %v3006_v61 = vor.u32 %v3629_v2, %v3003_v3  ;;  %v3646_v30 = vld [vmem:[#allocation9 + $0x4e4] sm:$0xf0]  ;;  %v2953_v50 = vld [vmem:[#allocation9 + $0x60] sm:$0xf]  ;;  %v3041_v2 = vld [vmem:[#allocation9 + $0x3d0] sm:$0xf] }
 0x15b   :  { %v3640_v3 = vld [vmem:[#allocation9 + $0x3f4] sm:$0xf0] }
 0x15c   :  { %1190 = vmatpush.bf16.msra.mxu0 %v2822_v42  ;;  %v3644_v42 = vld [vmem:[#allocation9 + $0x494] sm:$0xf0] }
 0x199   :  { %v633_v11 = vpop.f32.mrf.mxu0  ;;  %v646_v12 = vpop.f32.mrf.mxu1 }
 0x19a   :  { %v634_v17 = vadd.f32 %v633_v11, %v271_v4  ;;  %v2994_v11 = vor.u32 %v3628_v9, %v2993_v8 }
 0x19c   :  { %v647_v23 = vadd.f32 %v646_v12, %v634_v17  ;;  %v2995_v12 = vld [vmem:[#allocation9 + $0x218] sm:$0xf0]  ;;  %v2986_v17 = vor.u32 %v3626_v15, %v2985_v14  ;;  %v3035_v14 = vld [vmem:[#allocation9 + $0x3a8] sm:$0xf0] }
 0x19d   :  { %v2998_v13 = vor.u32 %v3627_v10, %v2995_v12  ;;  %v3033_v10 = vld [vmem:[#allocation9 + $0x380] sm:$0xf]  ;;  %v3637_v12 = vld [vmem:[#allocation9 + $0x384] sm:$0xf] }
 0x19e   :  { %v703_v27 = vmul.f32 0.01, %v647_v23  ;;  %v607_v28 = vpop.f32.mrf.mxu2  ;;  %v620_v29 = vpop.f32.mrf.mxu3  ;;  %v3038_v15 = vor.u32 %v3637_v12, %v3035_v14  ;;  %v3125_v12 = vld [vmem:[#allocation9 + $0x430] sm:$0xf] }
 0x19f   :  { %v608_v31 = vadd.f32 %v607_v28, %v270_v20  ;;  %v2977_v20 = vld [vmem:[#allocation9 + $0x150] sm:$0xf]  ;;  %v3065_v28 = vld [vmem:[#allocation9 + $0x4c0] sm:$0xf] }
 0x1a0   :  { %v707_v32 = vmax.f32 %v647_v23, %v703_v27  ;;  %v2978_v23 = vor.u32 %v3624_v21, %v2977_v20  ;;  %v3622_v27 = vld [vmem:[#allocation9 + $0x124] sm:$0xf0]  ;;  %v3066_v33 = vor.u32 %v3646_v30, %v3065_v28  ;;  %v3027_v20 = vld [vmem:[#allocation9 + $0x358] sm:$0xf0] }
 0x1a1   :  { %v621_v34 = vadd.f32 %v620_v29, %v608_v31  ;;  %v635_v35 = vpop.f32.mrf.mxu0  ;;  %v648_v36 = vpop.f32.mrf.mxu1  ;;  %v2970_v29 = vor.u32 %v3622_v27, %v2969_v26  ;;  %v3621_v31 = vld [vmem:[#allocation9 + $0x104] sm:$0xf]  ;;  %v3030_v21 = vor.u32 %v3635_v18, %v3027_v20  ;;  %v3019_v27 = vld [vmem:[#allocation9 + $0x308] sm:$0xf0]  ;;  %v3121_v18 = vld [vmem:[#allocation9 + $0x3e0] sm:$0xf] }
 0x1a2   :  { %v775_v37 = vpack.c.bf16 %v707_v32, %v707_v32  ;;  %v2971_v32 = vld [vmem:[#allocation9 + $0x128] sm:$0xf0]  ;;  %v3645_v35 = vld [vmem:[#allocation9 + $0x4c4] sm:$0xf] }
 0x1a3   :  { %v702_v38 = vmul.f32 0.01, %v621_v34  ;;  %v3067_v36 = vld [vmem:[#allocation9 + $0x4e8] sm:$0xf0] }
 0x1a4   :  { %1126 = vmatmul.bf16.vlgmr.msra.gmra.mxu3 %v775_v37  ;;  %v779_v28 = vld [vmem:[#allocation12 + $0x2] ss:$8 sm:$0x3] }
 0x1a5   :  { %v706_v41 = vmax.f32 %v621_v34, %v702_v38  ;;  %v2974_v34 = vor.u32 %v3621_v31, %v2971_v32  ;;  %1427 = vmatpush.bf16.msra.mxu3 %v3066_v33  ;;  %v2961_v38 = vld [vmem:[#allocation9 + $0xb0] sm:$0xf]  ;;  %v3632_v32 = vld [vmem:[#allocation9 + $0x2b4] sm:$0xf0]  ;;  %v3631_v33 = vld [vmem:[#allocation9 + $0x294] sm:$0xf] }
 0x1a6   :  { %v609_v43 = vpop.f32.mrf.mxu2  ;;  %v622_v44 = vpop.f32.mrf.mxu3  ;;  %v3009_v31 = vld [vmem:[#allocation9 + $0x290] sm:$0xf] }
 0x1a7   :  { %v774_v46 = vpack.c.bf16 %v706_v41, %v706_v41  ;;  %v2962_v41 = vor.u32 %v3620_v39, %v2961_v38  ;;  %v3619_v43 = vld [vmem:[#allocation9 + $0xb4] sm:$0xf]  ;;  %v2963_v44 = vld [vmem:[#allocation9 + $0xd8] sm:$0xf0] }
 0x1a9   :  { %v685_v47 = vpop.f32.mrf.mxu0  ;;  %v698_v48 = vpop.f32.mrf.mxu1  ;;  %1113 = vmatmul.bf16.vlgmr.msra.gmra.mxu2 %v774_v46 }
 0x1aa   :  { %v686_v51 = vadd.f32 %v685_v47, %v273_v45  ;;  %1414 = vmatpush.bf16.msra.mxu2 %v3002_v52  ;;  %v3058_v45 = vor.u32 %v3644_v42, %v3057_v40  ;;  %v3643_v47 = vld [vmem:[#allocation9 + $0x474] sm:$0xf]  ;;  %v3049_v52 = vld [vmem:[#allocation9 + $0x420] sm:$0xf]  ;;  %v3662_v42 = vld [vmem:[#allocation9 + $0x4f4] sm:$0xf0] }
 0x1ac   :  { %v699_v54 = vadd.f32 %v698_v48, %v686_v51  ;;  %v3059_v48 = vld [vmem:[#allocation9 + $0x498] sm:$0xf0]  ;;  %1428 = vmatpush.bf16.msra.mxu3 %v3058_v45  ;;  %v3618_v51 = vld [vmem:[#allocation9 + $0x84] sm:$0xf0] }
 0x1ad   :  { %v3062_v49 = vor.u32 %v3643_v47, %v3059_v48  ;;  %v3661_v45 = vld [vmem:[#allocation9 + $0x4a4] sm:$0xf0] }
 0x1ae   :  { %v705_v55 = vmul.f32 0.01, %v699_v54  ;;  %v659_v56 = vpop.f32.mrf.mxu2  ;;  %v672_v57 = vpop.f32.mrf.mxu3  ;;  %1415 = vmatpush.bf16.msra.mxu2 %v2994_v11  ;;  %v3638_v11 = vld [vmem:[#allocation9 + $0x3a4] sm:$0xf0] }
 0x1af   :  { %v660_v58 = vadd.f32 %v659_v56, %v272_v53  ;;  %v2954_v53 = vor.u32 %v3618_v51, %v2953_v50  ;;  %v2955_v56 = vld [vmem:[#allocation9 + $0x88] sm:$0xf0] }
 0x1b0   :  { %v709_v59 = vmax.f32 %v699_v54, %v705_v55  ;;  %v3642_v54 = vld [vmem:[#allocation9 + $0x444] sm:$0xf0]  ;;  %v3617_v55 = vld [vmem:[#allocation9 + $0x64] sm:$0xf] }
 0x1b1   :  { %v673_v60 = vadd.f32 %v672_v57, %v660_v58  ;;  %v687_v62 = vpop.f32.mrf.mxu0  ;;  %v700_v63 = vpop.f32.mrf.mxu1  ;;  %v3050_v57 = vor.u32 %v3642_v54, %v3049_v52  ;;  %v2958_v58 = vor.u32 %v3617_v55, %v2955_v56 }
 0x1b2   :  { %v777_v0 = vpack.c.bf16 %v709_v59, %v709_v59  ;;  %1416 = vmatpush.bf16.msra.mxu2 %v2986_v17  ;;  %v3641_v59 = vld [vmem:[#allocation9 + $0x424] sm:$0xf]  ;;  %v2945_v63 = vld [vmem:[#allocation9 + $0x10] sm:$0xf]  ;;  %v3636_v17 = vld [vmem:[#allocation9 + $0x354] sm:$0xf0] }
 0x1b3   :  { %v704_v1 = vmul.f32 0.01, %v673_v60  ;;  %1429 = vmatpush.bf16.msra.mxu3 %v3050_v57  ;;  %v782_v57 = vperm.slane %v779_v28, 1 }
 0x1b4   :  { %1152 = vmatmul.bf16.vlgmr.msrb.gmra.mxu1 %v777_v0  ;;  %1178 = vmatmul.bf16.vlgmr.msrb.gmra.mxu3 %v775_v37  ;;  %v3070_v37 = vor.u32 %v3645_v35, %v3067_v36  ;;  %v3010_v35 = vor.u32 %v3632_v32, %v3009_v31  ;;  %v3011_v36 = vld [vmem:[#allocation9 + $0x2b8] sm:$0xf0]  ;;  %v3657_v31 = vld [vmem:[#allocation9 + $0x364] sm:$0xf0] }
 0x1b5   :  { %v708_v4 = vmax.f32 %v673_v60, %v704_v1  ;;  %v3051_v60 = vld [vmem:[#allocation9 + $0x448] sm:$0xf0] }
 0x1b6   :  { %v661_v5 = vpop.f32.mrf.mxu2  ;;  %v674_v6 = vpop.f32.mrf.mxu3  ;;  %1417 = vmatpush.bf16.msra.mxu2 %v2978_v23  ;;  %1453 = vmatpush.bf16.msrb.mxu1 %v3070_v37  ;;  %v3054_v62 = vor.u32 %v3641_v59, %v3051_v60  ;;  %v3017_v23 = vld [vmem:[#allocation9 + $0x2e0] sm:$0xf]  ;;  %v3014_v37 = vor.u32 %v3631_v33, %v3011_v36  ;;  %v3085_v33 = vld [vmem:[#allocation9 + $0x110] sm:$0xf] }
 0x1b7   :  { %v776_v7 = vpack.c.bf16 %v708_v4, %v708_v4  ;;  %v3615_v4 = vld [vmem:[#allocation9 + $0x14] sm:$0xf]  ;;  %v3042_v5 = vor.u32 %v3640_v3, %v3041_v2  ;;  %v2947_v6 = vld [vmem:[#allocation9 + $0x38] sm:$0xf0]  ;;  %v3018_v26 = vor.u32 %v3634_v24, %v3017_v23  ;;  %v3117_v24 = vld [vmem:[#allocation9 + $0x390] sm:$0xf] }
 0x1b8   :  { %v2950_v8 = vor.u32 %v3615_v4, %v2947_v6  ;;  %v3109_v36 = vld [vmem:[#allocation9 + $0x2f0] sm:$0xf] }
 0x1b9   :  { %1139 = vmatmul.bf16.vlgmr.msrb.gmra.mxu0 %v776_v7  ;;  %1165 = vmatmul.bf16.vlgmr.msrb.gmra.mxu2 %v774_v46  ;;  %v2966_v46 = vor.u32 %v3619_v43, %v2963_v44  ;;  %v3129_v43 = vld [vmem:[#allocation9 + $0x480] sm:$0xf] }
 0x1ba   :  { %1440 = vmatpush.bf16.msrb.mxu0 %v3006_v61  ;;  %1418 = vmatpush.bf16.msra.mxu2 %v2970_v29  ;;  %v3639_v61 = vld [vmem:[#allocation9 + $0x3d4] sm:$0xf]  ;;  %v3130_v47 = vor.u32 %v3661_v45, %v3129_v43  ;;  %v3655_v43 = vld [vmem:[#allocation9 + $0x2c4] sm:$0xf0]  ;;  %v3077_v45 = vld [vmem:[#allocation9 + $0x70] sm:$0xf] }
 0x1bb   :  { %1454 = vmatpush.bf16.msrb.mxu1 %v3062_v49  ;;  %1430 = vmatpush.bf16.msra.mxu3 %v3042_v5 }
 0x1be   :  { %1441 = vmatpush.bf16.msrb.mxu0 %v2998_v13  ;;  %1419 = vmatpush.bf16.msra.mxu2 %v2962_v41  ;;  %v3034_v13 = vor.u32 %v3638_v11, %v3033_v10  ;;  %v3133_v41 = vld [vmem:[#allocation9 + $0x4d0] sm:$0xf]  ;;  %v3654_v10 = vld [vmem:[#allocation9 + $0x274] sm:$0xf0] }
 0x1bf   :  { %1455 = vmatpush.bf16.msrb.mxu1 %v3054_v62  ;;  %v3134_v44 = vor.u32 %v3662_v42, %v3133_v41  ;;  %v3105_v42 = vld [vmem:[#allocation9 + $0x2a0] sm:$0xf] }
 0x1c0   :  { %1431 = vmatpush.bf16.msra.mxu3 %v3034_v13  ;;  %v3660_v13 = vld [vmem:[#allocation9 + $0x454] sm:$0xf0] }
 0x1c1   :  { %v3126_v14 = vor.u32 %v3660_v13, %v3125_v12 }
 0x1c2   :  { %1442 = vmatpush.bf16.msrb.mxu0 %v2990_v19  ;;  %1420 = vmatpush.bf16.msra.mxu2 %v2954_v53  ;;  %v3026_v19 = vor.u32 %v3636_v17, %v3025_v16  ;;  %v3653_v16 = vld [vmem:[#allocation9 + $0x224] sm:$0xf0] }
 0x1c4   :  { %1204 = vmatmul.bf16.vlgmr.msra.gmra.mxu1 %v777_v0  ;;  %v3616_v0 = vld [vmem:[#allocation9 + $0x34] sm:$0xf0]  ;;  %1432 = vmatpush.bf16.msra.mxu3 %v3026_v19  ;;  %v3659_v19 = vld [vmem:[#allocation9 + $0x404] sm:$0xf0] }
 0x1c5   :  { %v2946_v1 = vor.u32 %v3616_v0, %v2945_v63  ;;  %v3122_v20 = vor.u32 %v3659_v19, %v3121_v18 }
 0x1c6   :  { %1443 = vmatpush.bf16.msrb.mxu0 %v2982_v25  ;;  %v3633_v25 = vld [vmem:[#allocation9 + $0x2e4] sm:$0xf] }
 0x1c7   :  { %1421 = vmatpush.bf16.msra.mxu2 %v2946_v1  ;;  %v3022_v29 = vor.u32 %v3633_v25, %v3019_v27  ;;  %v3658_v25 = vld [vmem:[#allocation9 + $0x3b4] sm:$0xf0] }
 0x1c8   :  { %1433 = vmatpush.bf16.msra.mxu3 %v3018_v26  ;;  %v3089_v26 = vld [vmem:[#allocation9 + $0x160] sm:$0xf]  ;;  %v3118_v27 = vor.u32 %v3658_v25, %v3117_v24  ;;  %v3665_v24 = vld [vmem:[#allocation7 + $0x60] sm:$0xf0] }
 0x1c9   :  { %1191 = vmatmul.bf16.vlgmr.msra.gmra.mxu0 %v776_v7  ;;  %v3043_v7 = vld [vmem:[#allocation9 + $0x3f8] sm:$0xf0] }
 0x1ca   :  { %1444 = vmatpush.bf16.msrb.mxu0 %v2974_v34  ;;  %v3046_v9 = vor.u32 %v3639_v61, %v3043_v7  ;;  %v781_v34 = vperm.slane %v779_v28, 0  ;;  %v3651_v28 = vld [vmem:[#allocation9 + $0x184] sm:$0xf0] }
 0x1cc   :  { %1456 = vmatpush.bf16.msrb.mxu1 %v3046_v9  ;;  %1434 = vmatpush.bf16.msra.mxu3 %v3010_v35  ;;  %v3101_v9 = vld [vmem:[#allocation9 + $0x250] sm:$0xf] }
 0x1cd   :  { %v3102_v11 = vor.u32 %v3654_v10, %v3101_v9 }
 0x1ce   :  { %1445 = vmatpush.bf16.msrb.mxu0 %v2966_v46 }
 0x1cf   :  { %1601 = vmatpush.bf16.msrb.mxu2 %v3102_v11 }
 0x1d0   :  { %1457 = vmatpush.bf16.msrb.mxu1 %v3038_v15  ;;  %1614 = vmatpush.bf16.msrb.mxu3 %v3134_v44  ;;  %v3097_v15 = vld [vmem:[#allocation9 + $0x200] sm:$0xf]  ;;  %v3106_v44 = vor.u32 %v3655_v43, %v3105_v42 }
 0x1d1   :  { %v3098_v17 = vor.u32 %v3653_v16, %v3097_v15 }
 0x1d2   :  { %1446 = vmatpush.bf16.msrb.mxu0 %v2958_v58 }
 0x1d3   :  { %1602 = vmatpush.bf16.msrb.mxu2 %v3098_v17 }
 0x1d4   :  { %1458 = vmatpush.bf16.msrb.mxu1 %v3030_v21  ;;  %1615 = vmatpush.bf16.msrb.mxu3 %v3130_v47  ;;  %v3093_v21 = vld [vmem:[#allocation9 + $0x1b0] sm:$0xf] }
 0x1d6   :  { %1447 = vmatpush.bf16.msrb.mxu0 %v2950_v8 }
 0x1d8   :  { %1459 = vmatpush.bf16.msrb.mxu1 %v3022_v29  ;;  %1616 = vmatpush.bf16.msrb.mxu3 %v3126_v14  ;;  %v3090_v29 = vor.u32 %v3651_v28, %v3089_v26  ;;  %v3141_v26 = vld [vmem:[#allocation7 + $0x28] sm:$0xf] }
 0x1dc   :  { %1460 = vmatpush.bf16.msrb.mxu1 %v3014_v37  ;;  %1617 = vmatpush.bf16.msrb.mxu3 %v3122_v20  ;;  %v3656_v37 = vld [vmem:[#allocation9 + $0x314] sm:$0xf0] }
 0x1dd   :  { %v3149_v20 = vld [vmem:[#allocation7 + $0x78] sm:$0xf] }
 0x1e0   :  { %1618 = vmatpush.bf16.msrb.mxu3 %v3118_v27  ;;  %v3664_v27 = vld [vmem:[#allocation7 + $0x38] sm:$0xf0] }
 0x1e1   :  { %v3142_v28 = vor.u32 %v3664_v27, %v3141_v26  ;;  %v3289_v26 = vld [vmem:[#allocation9 + $0x248] sm:$0xf]  ;;  %v3702_v27 = vld [vmem:[#allocation9 + $0x26c] sm:$0xf0] }
 0x227   :  { %v1127_v22 = vpop.f32.mrf.mxu3 }
 0x22c   :  { %v1114_v30 = vpop.f32.mrf.mxu2 }
 0x22d   :  { %v1115_v39 = vadd.f32 %v1114_v30, %v781_v34  ;;  %v3113_v30 = vld [vmem:[#allocation9 + $0x340] sm:$0xf]  ;;  %v3650_v34 = vld [vmem:[#allocation9 + $0x134] sm:$0xf0] }
 0x22e   :  { %v3114_v32 = vor.u32 %v3657_v31, %v3113_v30  ;;  %v3086_v35 = vor.u32 %v3650_v34, %v3085_v33  ;;  %v3663_v30 = vld [vmem:[#allocation7 + $0x10] sm:$0xf0]  ;;  %v3686_v33 = vld [vmem:[#allocation7 + $0x12c] sm:$0xf0]  ;;  %v3685_v34 = vld [vmem:[#allocation7 + $0x120] sm:$0xf] }
 0x22f   :  { %v1129_v38 = vpop.f32.mrf.mxu3  ;;  %v1128_v48 = vadd.f32 %v1127_v22, %v1115_v39  ;;  %v3652_v22 = vld [vmem:[#allocation9 + $0x1d4] sm:$0xf0]  ;;  %v3081_v39 = vld [vmem:[#allocation9 + $0xc0] sm:$0xf] }
 0x230   :  { %v3094_v23 = vor.u32 %v3652_v22, %v3093_v21  ;;  %1619 = vmatpush.bf16.msrb.mxu3 %v3114_v32  ;;  %v3110_v38 = vor.u32 %v3656_v37, %v3109_v36  ;;  %v3666_v21 = vld [vmem:[#allocation7 + $0x88] sm:$0xf0]  ;;  %v3225_v32 = vld [vmem:[#allocation7 + $0x11c] sm:$0xf]  ;;  %v3227_v36 = vld [vmem:[#allocation7 + $0x130] sm:$0xf0] }
 0x231   :  { %v1153_v40 = vpop.f32.mrf.mxu1  ;;  %v3150_v22 = vor.u32 %v3666_v21, %v3149_v20  ;;  %v3217_v37 = vld [vmem:[#allocation7 + $0xf4] sm:$0xf]  ;;  %v3169_v20 = vld [vmem:[#allocation7 + $0x4] sm:$0xf]  ;;  %v3672_v21 = vld [vmem:[#allocation7 + $0x14] sm:$0xf0] }
 0x232   :  { %1603 = vmatpush.bf16.msrb.mxu2 %v3094_v23  ;;  %v3145_v23 = vld [vmem:[#allocation7 + $0x50] sm:$0xf] }
 0x233   :  { %v3146_v25 = vor.u32 %v3665_v24, %v3145_v23  ;;  %v3170_v23 = vor.u32 %v3672_v21, %v3169_v20  ;;  %v3171_v24 = vld [vmem:[#allocation7 + $0x18] sm:$0xf0] }
 0x234   :  { %v1116_v46 = vpop.f32.mrf.mxu2  ;;  %1620 = vmatpush.bf16.msrb.mxu3 %v3110_v38  ;;  %v3684_v38 = vld [vmem:[#allocation7 + $0x104] sm:$0xf0] }
 0x235   :  { %v3648_v46 = vld [vmem:[#allocation9 + $0x94] sm:$0xf0]  ;;  %v3218_v42 = vor.u32 %v3684_v38, %v3217_v37  ;;  %v3718_v38 = vld [vmem:[#allocation9 + $0x4ec] sm:$0xf0] }
 0x236   :  { %v1140_v49 = vpop.f32.mrf.mxu0  ;;  %1604 = vmatpush.bf16.msrb.mxu2 %v3090_v29  ;;  %v3078_v47 = vor.u32 %v3648_v46, %v3077_v45  ;;  %v3137_v29 = vld [vmem:[#allocation7] sm:$0xf]  ;;  %v3681_v46 = vld [vmem:[#allocation7 + $0xd0] sm:$0xf] }
 0x237   :  { %v1141_v50 = vadd.f32 %v1140_v49, %v1128_v48  ;;  %v1179_v51 = vpop.f32.mrf.mxu3  ;;  %v3073_v48 = vld [vmem:[#allocation9 + $0x20] sm:$0xf]  ;;  %v3647_v49 = vld [vmem:[#allocation9 + $0x44] sm:$0xf0]  ;;  %v3138_v31 = vor.u32 %v3663_v30, %v3137_v29  ;;  %v3290_v29 = vor.u32 %v3702_v27, %v3289_v26  ;;  %v3291_v30 = vld [vmem:[#allocation9 + $0x270] sm:$0xf0] }
 0x238   :  { %1621 = vmatpush.bf16.msrb.mxu3 %v3106_v44  ;;  %v3209_v44 = vld [vmem:[#allocation7 + $0xcc] sm:$0xf]  ;;  %v3682_v45 = vld [vmem:[#allocation7 + $0xdc] sm:$0xf0] }
 0x239   :  { %v1154_v52 = vadd.f32 %v1153_v40, %v1141_v50  ;;  %v1155_v53 = vpop.f32.mrf.mxu1  ;;  %v3649_v40 = vld [vmem:[#allocation9 + $0xe4] sm:$0xf0]  ;;  %v3074_v50 = vor.u32 %v3647_v49, %v3073_v48  ;;  %v3210_v48 = vor.u32 %v3682_v45, %v3209_v44  ;;  %v3698_v45 = vld [vmem:[#allocation9 + $0x1cc] sm:$0xf0] }
 0x23a   :  { %1605 = vmatpush.bf16.msrb.mxu2 %v3086_v35  ;;  %v3082_v41 = vor.u32 %v3649_v40, %v3081_v39  ;;  %v3161_v53 = vld [vmem:[#allocation7 + $0xf0] sm:$0xf]  ;;  %v3226_v35 = vor.u32 %v3686_v33, %v3225_v32  ;;  %v3230_v39 = vor.u32 %v3685_v34, %v3227_v36  ;;  %v3683_v40 = vld [vmem:[#allocation7 + $0xf8] sm:$0xf]  ;;  %v3700_v32 = vld [vmem:[#allocation9 + $0x21c] sm:$0xf0] }
 0x23b   :  { %v1209_v54 = vmul.f32 0.01, %v1154_v52  ;;  %v3699_v34 = vld [vmem:[#allocation9 + $0x1fc] sm:$0xf]  ;;  %v3353_v36 = vld [vmem:[#allocation9 + $0x4c8] sm:$0xf] }
 0x23c   :  { %v1166_v55 = vpop.f32.mrf.mxu2  ;;  %1814 = vmatpush.bf16.msra.mxu1 %v3226_v35  ;;  %v3283_v35 = vld [vmem:[#allocation9 + $0x220] sm:$0xf0]  ;;  %v3273_v44 = vld [vmem:[#allocation9 + $0x1a8] sm:$0xf] }
 0x23d   :  { %v1211_v56 = vmax.f32 %v1154_v52, %v1209_v54  ;;  %v1167_v62 = vadd.f32 %v1166_v55, %v782_v57  ;;  %v3670_v52 = vld [vmem:[#allocation7 + $0x128] sm:$0xf0] }
 0x23e   :  { %v1142_v58 = vpop.f32.mrf.mxu0  ;;  %1606 = vmatpush.bf16.msrb.mxu2 %v3082_v41  ;;  %v3219_v41 = vld [vmem:[#allocation7 + $0x108] sm:$0xf0] }
 0x23f   :  { %v1245_v59 = vpack.c.bf16 %v1211_v56, %v1211_v56  ;;  %v1181_v60 = vpop.f32.mrf.mxu3  ;;  %v1180_v1 = vadd.f32 %v1179_v51, %v1167_v62  ;;  %v3165_v51 = vld [vmem:[#allocation7 + $0x118] sm:$0xf]  ;;  %v3669_v56 = vld [vmem:[#allocation7 + $0x100] sm:$0xf0]  ;;  %v3157_v58 = vld [vmem:[#allocation7 + $0xc8] sm:$0xf]  ;;  %v3222_v43 = vor.u32 %v3683_v40, %v3219_v41  ;;  %v3286_v41 = vor.u32 %v3699_v34, %v3283_v35 }
 0x240   :  { %v3166_v55 = vor.u32 %v3670_v52, %v3165_v51  ;;  %v3162_v57 = vor.u32 %v3669_v56, %v3161_v53  ;;  %1815 = vmatpush.bf16.msra.mxu1 %v3218_v42  ;;  %v3680_v51 = vld [vmem:[#allocation7 + $0xb4] sm:$0xf0]  ;;  %v3679_v52 = vld [vmem:[#allocation7 + $0xa8] sm:$0xf]  ;;  %v3203_v53 = vld [vmem:[#allocation7 + $0xb8] sm:$0xf0]  ;;  %v3354_v42 = vor.u32 %v3718_v38, %v3353_v36 }
 0x241   :  { %v1205_v63 = vpop.f32.mrf.mxu1  ;;  %1422 = vmatmul.bf16.vlgmr.msra.gmra.mxu2 %v1245_v59  ;;  %1448 = vmatmul.bf16.vlgmr.msrb.gmra.mxu0 %v1245_v59  ;;  %v3668_v59 = vld [vmem:[#allocation7 + $0xd8] sm:$0xf0]  ;;  %v3355_v40 = vld [vmem:[#allocation9 + $0x4f0] sm:$0xf0]  ;;  %v3241_v35 = vld [vmem:[#allocation9 + $0x68] sm:$0xf] }
 0x242   :  { %1607 = vmatpush.bf16.msrb.mxu2 %v3078_v47  ;;  %1695 = vmatpush.bf16.msra.mxu0 %v3166_v55  ;;  %v3158_v62 = vor.u32 %v3668_v59, %v3157_v58  ;;  %v3211_v47 = vld [vmem:[#allocation7 + $0xe0] sm:$0xf0]  ;;  %v3206_v55 = vor.u32 %v3679_v52, %v3203_v53  ;;  %v3193_v56 = vld [vmem:[#allocation7 + $0x7c] sm:$0xf]  ;;  %v3677_v58 = vld [vmem:[#allocation7 + $0x80] sm:$0xf]  ;;  %v3274_v53 = vor.u32 %v3698_v45, %v3273_v44 }
 0x243   :  { %v3214_v49 = vor.u32 %v3681_v46, %v3211_v47  ;;  %v3195_v59 = vld [vmem:[#allocation7 + $0x90] sm:$0xf0]  ;;  %v3697_v46 = vld [vmem:[#allocation9 + $0x1ac] sm:$0xf]  ;;  %v3347_v52 = vld [vmem:[#allocation9 + $0x4a0] sm:$0xf0] }
 0x244   :  { %v1168_v0 = vpop.f32.mrf.mxu2  ;;  %1816 = vmatpush.bf16.msra.mxu1 %v3210_v48  ;;  %v3275_v47 = vld [vmem:[#allocation9 + $0x1d0] sm:$0xf0]  ;;  %v3345_v48 = vld [vmem:[#allocation9 + $0x478] sm:$0xf]  ;;  %v3690_v36 = vld [vmem:[#allocation9 + $0x8c] sm:$0xf0] }
 0x245   :  { %v3667_v0 = vld [vmem:[#allocation7 + $0xb0] sm:$0xf0]  ;;  %v3242_v38 = vor.u32 %v3690_v36, %v3241_v35  ;;  %v3315_v45 = vld [vmem:[#allocation9 + $0x360] sm:$0xf0] }
 0x246   :  { %v1192_v2 = vpop.f32.mrf.mxu0  ;;  %1608 = vmatpush.bf16.msrb.mxu2 %v3074_v50  ;;  %1696 = vmatpush.bf16.msra.mxu0 %v3162_v57  ;;  %v3201_v50 = vld [vmem:[#allocation7 + $0xa4] sm:$0xf]  ;;  %v3678_v57 = vld [vmem:[#allocation7 + $0x8c] sm:$0xf0] }
 0x247   :  { %v1193_v3 = vadd.f32 %v1192_v2, %v1180_v1  ;;  %v1248_v1 = vld [vmem:[#allocation12 + $0x3] ss:$8 sm:$0x3] }
 0x249   :  { %v1206_v4 = vadd.f32 %v1205_v63, %v1193_v3  ;;  %v1207_v5 = vpop.f32.mrf.mxu1  ;;  %v3153_v63 = vld [vmem:[#allocation7 + $0xa0] sm:$0xf] }
 0x24a   :  { %1697 = vmatpush.bf16.msra.mxu0 %v3158_v62  ;;  %v3154_v3 = vor.u32 %v3667_v0, %v3153_v63  ;;  %1827 = vmatpush.bf16.msra.mxu2 %v3230_v39  ;;  %v3194_v62 = vor.u32 %v3678_v57, %v3193_v56  ;;  %v3198_v63 = vor.u32 %v3677_v58, %v3195_v59  ;;  %v3185_v0 = vld [vmem:[#allocation7 + $0x54] sm:$0xf]  ;;  %v3717_v39 = vld [vmem:[#allocation9 + $0x4cc] sm:$0xf]  ;;  %v3696_v56 = vld [vmem:[#allocation9 + $0x17c] sm:$0xf0] }
 0x24b   :  { %v1210_v6 = vmul.f32 0.01, %v1206_v4  ;;  %v3278_v57 = vor.u32 %v3697_v46, %v3275_v47  ;;  %v3337_v58 = vld [vmem:[#allocation9 + $0x428] sm:$0xf]  ;;  %v3714_v59 = vld [vmem:[#allocation9 + $0x44c] sm:$0xf0] }
 0x24c   :  { %v3233_v47 = vld [vmem:[#allocation9 + $0x18] sm:$0xf] }
 0x24d   :  { %v1212_v61 = vmax.f32 %v1206_v4, %v1210_v6  ;;  %v1251_v4 = vperm.slane %v1248_v1, 1 }
 0x24e   :  { %v1194_v7 = vpop.f32.mrf.mxu0  ;;  %1698 = vmatpush.bf16.msra.mxu0 %v3154_v3  ;;  %1828 = vmatpush.bf16.msra.mxu2 %v3222_v43  ;;  %v3187_v3 = vld [vmem:[#allocation7 + $0x68] sm:$0xf0]  ;;  %v3358_v43 = vor.u32 %v3717_v39, %v3355_v40  ;;  %v3243_v39 = vld [vmem:[#allocation9 + $0x90] sm:$0xf0] }
 0x24f   :  { %v1246_v8 = vpack.c.bf16 %v1212_v61, %v1212_v61  ;;  %v1250_v7 = vperm.slane %v1248_v1, 0  ;;  %v3676_v1 = vld [vmem:[#allocation7 + $0x64] sm:$0xf0] }
 0x251   :  { %1435 = vmatmul.bf16.vlgmr.msra.gmra.mxu3 %v1246_v8  ;;  %1461 = vmatmul.bf16.vlgmr.msrb.gmra.mxu1 %v1246_v8 }
 0x252   :  { %1699 = vmatpush.bf16.msra.mxu0 %v3150_v22  ;;  %1829 = vmatpush.bf16.msra.mxu2 %v3214_v49  ;;  %v3671_v22 = vld [vmem:[#allocation7 + $0x8] sm:$0xf]  ;;  %v3716_v49 = vld [vmem:[#allocation9 + $0x49c] sm:$0xf0] }
 0x253   :  { %2045 = vmatpush.bf16.msra.mxu3 %v3290_v29  ;;  %v3321_v29 = vld [vmem:[#allocation9 + $0x388] sm:$0xf] }
 0x256   :  { %1700 = vmatpush.bf16.msra.mxu0 %v3146_v25  ;;  %1830 = vmatpush.bf16.msra.mxu2 %v3206_v55  ;;  %v3174_v25 = vor.u32 %v3671_v22, %v3171_v24  ;;  %v3265_v55 = vld [vmem:[#allocation9 + $0x158] sm:$0xf]  ;;  %v1646_v22 = vld [vmem:[#allocation12 + $0x5] ss:$0 sm:$0xff] }
 0x25a   :  { %1701 = vmatpush.bf16.msra.mxu0 %v3142_v28  ;;  %1831 = vmatpush.bf16.msra.mxu2 %v3198_v63  ;;  %v3701_v28 = vld [vmem:[#allocation9 + $0x24c] sm:$0xf]  ;;  %v3267_v63 = vld [vmem:[#allocation9 + $0x180] sm:$0xf0] }
 0x25b   :  { %v3294_v33 = vor.u32 %v3701_v28, %v3291_v30  ;;  %v3710_v30 = vld [vmem:[#allocation9 + $0x3ac] sm:$0xf0] }
 0x25e   :  { %1702 = vmatpush.bf16.msra.mxu0 %v3138_v31  ;;  %v3281_v31 = vld [vmem:[#allocation9 + $0x1f8] sm:$0xf] }
 0x25f   :  { %v3282_v37 = vor.u32 %v3700_v32, %v3281_v31  ;;  %v3709_v31 = vld [vmem:[#allocation9 + $0x38c] sm:$0xf]  ;;  %v3322_v32 = vor.u32 %v3710_v30, %v3321_v29 }
 0x261   :  { %2046 = vmatpush.bf16.msra.mxu3 %v3282_v37  ;;  %v3689_v37 = vld [vmem:[#allocation9 + $0x6c] sm:$0xf] }
 0x262   :  { %2058 = vmatpush.bf16.msrb.mxu0 %v3354_v42  ;;  %v3246_v40 = vor.u32 %v3689_v37, %v3243_v39  ;;  %v3708_v42 = vld [vmem:[#allocation9 + $0x35c] sm:$0xf0]  ;;  %v3373_v37 = vld [vmem:[#allocation9 + $0x114] sm:$0xf]  ;;  %v3409_v39 = vld [vmem:[#allocation9 + $0x3e4] sm:$0xf] }
 0x265   :  { %2047 = vmatpush.bf16.msra.mxu3 %v3274_v53  ;;  %v3305_v53 = vld [vmem:[#allocation9 + $0x2e8] sm:$0xf] }
 0x2be   :  { %v1449_v54 = vpop.f32.mrf.mxu0 }
 0x2bf   :  { %v1450_v6 = vadd.f32 %v1449_v54, %v1251_v4  ;;  %v3202_v54 = vor.u32 %v3680_v51, %v3201_v50  ;;  %v1504_v4 = vld [vmem:[#allocation12 + $0x4] ss:$0 sm:$0xff]  ;;  %v3346_v50 = vor.u32 %v3716_v49, %v3345_v48  ;;  %v3715_v51 = vld [vmem:[#allocation9 + $0x47c] sm:$0xf]  ;;  %v3688_v48 = vld [vmem:[#allocation9 + $0x3c] sm:$0xf0] }
 0x2c0   :  { %v3687_v49 = vld [vmem:[#allocation9 + $0x1c] sm:$0xf] }
 0x2c1   :  { %1817 = vmatpush.bf16.msra.mxu1 %v3202_v54  ;;  %v3350_v54 = vor.u32 %v3715_v51, %v3347_v52  ;;  %2059 = vmatpush.bf16.msrb.mxu0 %v3346_v50  ;;  %v3234_v50 = vor.u32 %v3688_v48, %v3233_v47  ;;  %v3235_v51 = vld [vmem:[#allocation9 + $0x40] sm:$0xf0]  ;;  %v3730_v47 = vld [vmem:[#allocation9 + $0x3b8] sm:$0xf0] }
 0x2c2   :  { %v3238_v52 = vor.u32 %v3687_v49, %v3235_v51  ;;  %v3365_v49 = vld [vmem:[#allocation9 + $0x74] sm:$0xf]  ;;  %v3401_v51 = vld [vmem:[#allocation9 + $0x344] sm:$0xf] }
 0x2c4   :  { %v1423_v60 = vpop.f32.mrf.mxu2 }
 0x2c5   :  { %v1424_v10 = vadd.f32 %v1423_v60, %v1250_v7  ;;  %1818 = vmatpush.bf16.msra.mxu1 %v3194_v62  ;;  %v3695_v62 = vld [vmem:[#allocation9 + $0x15c] sm:$0xf] }
 0x2c6   :  { %v1451_v2 = vpop.f32.mrf.mxu0 }
 0x2c7   :  { %v3675_v2 = vld [vmem:[#allocation7 + $0x58] sm:$0xf] }
 0x2cc   :  { %v1425_v5 = vpop.f32.mrf.mxu2 }
 0x2cd   :  { %v3186_v5 = vor.u32 %v3676_v1, %v3185_v0  ;;  %v3339_v0 = vld [vmem:[#allocation9 + $0x450] sm:$0xf0]  ;;  %v3338_v1 = vor.u32 %v3714_v59, %v3337_v58  ;;  %v3297_v59 = vld [vmem:[#allocation9 + $0x298] sm:$0xf] }
 0x2ce   :  { %v1462_v61 = vpop.f32.mrf.mxu1 }
 0x2cf   :  { %v1463_v8 = vadd.f32 %v1462_v61, %v1450_v6  ;;  %v3190_v6 = vor.u32 %v3675_v2, %v3187_v3  ;;  %1819 = vmatpush.bf16.msra.mxu1 %v3186_v5  ;;  %v3329_v3 = vld [vmem:[#allocation9 + $0x3d8] sm:$0xf]  ;;  %v3712_v5 = vld [vmem:[#allocation9 + $0x3fc] sm:$0xf0]  ;;  %2060 = vmatpush.bf16.msrb.mxu0 %v3338_v1 }
 0x2d1   :  { %v1467_v9 = vmul.f32 0.01, %v1463_v8  ;;  %1832 = vmatpush.bf16.msra.mxu2 %v3190_v6  ;;  %v3711_v6 = vld [vmem:[#allocation9 + $0x3dc] sm:$0xf] }
 0x2d3   :  { %v1469_v11 = vmax.f32 %v1463_v8, %v1467_v9 }
 0x2d4   :  { %v1436_v12 = vpop.f32.mrf.mxu3 }
 0x2d5   :  { %v1503_v13 = vpack.c.bf16 %v1469_v11, %v1469_v11  ;;  %v1437_v14 = vadd.f32 %v1436_v12, %v1424_v10 }
 0x2d6   :  { %v1464_v15 = vpop.f32.mrf.mxu1 }
 0x2d7   :  { %v1466_v16 = vmul.f32 0.01, %v1437_v14  ;;  %1622 = vmatmul.bf16.vlgmr.msrb.gmra.mxu3 %v1503_v13  ;;  %v3674_v15 = vld [vmem:[#allocation7 + $0x3c] sm:$0xf0] }
 0x2d9   :  { %v1468_v17 = vmax.f32 %v1437_v14, %v1466_v16  ;;  %v3177_v14 = vld [vmem:[#allocation7 + $0x2c] sm:$0xf]  ;;  %v3673_v16 = vld [vmem:[#allocation7 + $0x30] sm:$0xf] }
 0x2db   :  { %v1502_v18 = vpack.c.bf16 %v1468_v17, %v1468_v17  ;;  %v3178_v17 = vor.u32 %v3674_v15, %v3177_v14 }
 0x2dc   :  { %v1438_v19 = vpop.f32.mrf.mxu3 }
 0x2dd   :  { %1609 = vmatmul.bf16.vlgmr.msrb.gmra.mxu2 %v1502_v18  ;;  %v3179_v18 = vld [vmem:[#allocation7 + $0x40] sm:$0xf0]  ;;  %1820 = vmatpush.bf16.msra.mxu1 %v3178_v17  ;;  %v3692_v17 = vld [vmem:[#allocation9 + $0xdc] sm:$0xf0] }
 0x2de   :  { %v3182_v19 = vor.u32 %v3673_v16, %v3179_v18  ;;  %v3249_v16 = vld [vmem:[#allocation9 + $0xb8] sm:$0xf]  ;;  %v3691_v18 = vld [vmem:[#allocation9 + $0xbc] sm:$0xf] }
 0x2df   :  { %v3250_v20 = vor.u32 %v3692_v17, %v3249_v16  ;;  %v3732_v16 = vld [vmem:[#allocation9 + $0x458] sm:$0xf0] }
 0x2e0   :  { %1833 = vmatpush.bf16.msra.mxu2 %v3182_v19  ;;  %v3251_v19 = vld [vmem:[#allocation9 + $0xe0] sm:$0xf0] }
 0x2e1   :  { %1821 = vmatpush.bf16.msra.mxu1 %v3170_v23  ;;  %v3254_v21 = vor.u32 %v3691_v18, %v3251_v19  ;;  %v3377_v18 = vld [vmem:[#allocation9 + $0x164] sm:$0xf]  ;;  %v3723_v19 = vld [vmem:[#allocation9 + $0x188] sm:$0xf0] }
 0x2e4   :  { %1834 = vmatpush.bf16.msra.mxu2 %v3174_v25 }
 0x2e5   :  { %2071 = vmatpush.bf16.msrb.mxu1 %v3294_v33  ;;  %v3323_v33 = vld [vmem:[#allocation9 + $0x3b0] sm:$0xf0] }
 0x2e6   :  { %v3326_v34 = vor.u32 %v3709_v31, %v3323_v33 }
 0x2e8   :  { %2084 = vmatpush.bf16.msrb.mxu2 %v3358_v43  ;;  %v3707_v43 = vld [vmem:[#allocation9 + $0x33c] sm:$0xf] }
 0x2e9   :  { %2072 = vmatpush.bf16.msrb.mxu1 %v3286_v41  ;;  %v3313_v41 = vld [vmem:[#allocation9 + $0x338] sm:$0xf]  ;;  %v3318_v46 = vor.u32 %v3707_v43, %v3315_v45  ;;  %v3369_v43 = vld [vmem:[#allocation9 + $0xc4] sm:$0xf]  ;;  %v3405_v45 = vld [vmem:[#allocation9 + $0x394] sm:$0xf] }
 0x2ea   :  { %v3314_v44 = vor.u32 %v3708_v42, %v3313_v41  ;;  %v3731_v41 = vld [vmem:[#allocation9 + $0x408] sm:$0xf0]  ;;  %v3406_v48 = vor.u32 %v3730_v47, %v3405_v45  ;;  %v3485_v45 = vld [vmem:[#allocation7 + $0x128] sm:$0xf]  ;;  %v3481_v47 = vld [vmem:[#allocation7 + $0x100] sm:$0xf] }
 0x2eb   :  { %v3410_v42 = vor.u32 %v3731_v41, %v3409_v39  ;;  %v3429_v39 = vld [vmem:[#allocation7 + $0x34] sm:$0xf] }
 0x2ec   :  { %2085 = vmatpush.bf16.msrb.mxu2 %v3350_v54  ;;  %v3706_v54 = vld [vmem:[#allocation9 + $0x30c] sm:$0xf0] }
 0x2ed   :  { %2073 = vmatpush.bf16.msrb.mxu1 %v3278_v57  ;;  %v3307_v57 = vld [vmem:[#allocation9 + $0x310] sm:$0xf0] }
 0x35a   :  { %v1623_v60 = vpop.f32.mrf.mxu3 }
 0x360   :  { %v1610_v61 = vpop.f32.mrf.mxu2 }
 0x361   :  { %v1611_v7 = vadd.f32 %v1610_v61, %v1504_v4  ;;  %v3266_v4 = vor.u32 %v3696_v56, %v3265_v55  ;;  %v3331_v61 = vld [vmem:[#allocation9 + $0x400] sm:$0xf0]  ;;  %v3306_v55 = vor.u32 %v3706_v54, %v3305_v53  ;;  %v3705_v56 = vld [vmem:[#allocation9 + $0x2ec] sm:$0xf] }
 0x362   :  { %v1625_v8 = vpop.f32.mrf.mxu3  ;;  %v3310_v58 = vor.u32 %v3705_v56, %v3307_v57  ;;  %v3729_v53 = vld [vmem:[#allocation9 + $0x368] sm:$0xf0]  ;;  %v3397_v57 = vld [vmem:[#allocation9 + $0x2f4] sm:$0xf] }
 0x363   :  { %v1624_v9 = vadd.f32 %v1623_v60, %v1611_v7  ;;  %v3713_v60 = vld [vmem:[#allocation9 + $0x42c] sm:$0xf]  ;;  %v3270_v7 = vor.u32 %v3695_v62, %v3267_v63  ;;  %v3257_v8 = vld [vmem:[#allocation9 + $0x108] sm:$0xf]  ;;  %2048 = vmatpush.bf16.msra.mxu3 %v3266_v4  ;;  %v3703_v62 = vld [vmem:[#allocation9 + $0x29c] sm:$0xf]  ;;  %v3402_v54 = vor.u32 %v3729_v53, %v3401_v51 }
 0x364   :  { %v3342_v2 = vor.u32 %v3713_v60, %v3339_v0  ;;  %v3704_v60 = vld [vmem:[#allocation9 + $0x2bc] sm:$0xf0]  ;;  %v3299_v0 = vld [vmem:[#allocation9 + $0x2c0] sm:$0xf0]  ;;  %v3719_v56 = vld [vmem:[#allocation9 + $0x48] sm:$0xf0] }
 0x365   :  { %v1627_v10 = vmul.f32 0.01, %v1624_v9  ;;  %2074 = vmatpush.bf16.msrb.mxu1 %v3270_v7  ;;  %v3298_v63 = vor.u32 %v3704_v60, %v3297_v59  ;;  %v3302_v1 = vor.u32 %v3703_v62, %v3299_v0  ;;  %v3385_v4 = vld [vmem:[#allocation9 + $0x204] sm:$0xf]  ;;  %v3734_v7 = vld [vmem:[#allocation9 + $0x4f8] sm:$0xf0] }
 0x366   :  { %2086 = vmatpush.bf16.msrb.mxu2 %v3342_v2  ;;  %v3389_v2 = vld [vmem:[#allocation9 + $0x254] sm:$0xf]  ;;  %v3728_v59 = vld [vmem:[#allocation9 + $0x318] sm:$0xf0]  ;;  %v3393_v62 = vld [vmem:[#allocation9 + $0x2a4] sm:$0xf] }
 0x367   :  { %v1628_v11 = vmax.f32 %v1624_v9, %v1627_v10  ;;  %v3694_v9 = vld [vmem:[#allocation9 + $0x12c] sm:$0xf0]  ;;  %v3693_v10 = vld [vmem:[#allocation9 + $0x10c] sm:$0xf]  ;;  %v3398_v60 = vor.u32 %v3728_v59, %v3397_v57  ;;  %v3477_v51 = vld [vmem:[#allocation7 + $0xd8] sm:$0xf] }
 0x368   :  { %v1612_v12 = vpop.f32.mrf.mxu2  ;;  %v3258_v14 = vor.u32 %v3694_v9, %v3257_v8  ;;  %v3417_v9 = vld [vmem:[#allocation9 + $0x484] sm:$0xf]  ;;  %v3469_v57 = vld [vmem:[#allocation7 + $0x88] sm:$0xf] }
 0x369   :  { %v1645_v13 = vpack.c.bf16 %v1628_v11, %v1628_v11  ;;  %v3259_v11 = vld [vmem:[#allocation9 + $0x130] sm:$0xf0]  ;;  %v3330_v12 = vor.u32 %v3712_v5, %v3329_v3  ;;  %v3726_v3 = vld [vmem:[#allocation9 + $0x278] sm:$0xf0] }
 0x36a   :  { %v3262_v15 = vor.u32 %v3693_v10, %v3259_v11  ;;  %2049 = vmatpush.bf16.msra.mxu3 %v3258_v14  ;;  %v3390_v5 = vor.u32 %v3726_v3, %v3389_v2  ;;  %v3733_v11 = vld [vmem:[#allocation9 + $0x4a8] sm:$0xf0]  ;;  %v3742_v2 = vld [vmem:[#allocation7 + $0x134] sm:$0xf0]  ;;  %v3449_v3 = vld [vmem:[#allocation7 + $0xfc] sm:$0xf] }
 0x36b   :  { %1703 = vmatmul.bf16.vlgmr.msra.gmra.mxu0 %v1645_v13  ;;  %v3334_v13 = vor.u32 %v3711_v6, %v3331_v61  ;;  %v3725_v6 = vld [vmem:[#allocation9 + $0x228] sm:$0xf0]  ;;  %v3421_v61 = vld [vmem:[#allocation9 + $0x4d4] sm:$0xf]  ;;  %v3418_v14 = vor.u32 %v3733_v11, %v3417_v9 }
 0x36c   :  { %2061 = vmatpush.bf16.msrb.mxu0 %v3330_v12  ;;  %2075 = vmatpush.bf16.msrb.mxu1 %v3262_v15  ;;  %v3422_v8 = vor.u32 %v3734_v7, %v3421_v61  ;;  %v3386_v10 = vor.u32 %v3725_v6, %v3385_v4  ;;  %v3381_v12 = vld [vmem:[#allocation9 + $0x1b4] sm:$0xf]  ;;  %v3740_v7 = vld [vmem:[#allocation7 + $0xe4] sm:$0xf0]  ;;  %v3441_v9 = vld [vmem:[#allocation7 + $0xac] sm:$0xf] }
 0x36d   :  { %2087 = vmatpush.bf16.msrb.mxu2 %v3334_v13  ;;  %v3724_v13 = vld [vmem:[#allocation9 + $0x1d8] sm:$0xf0]  ;;  %v3413_v15 = vld [vmem:[#allocation9 + $0x434] sm:$0xf] }
 0x36e   :  { %2050 = vmatpush.bf16.msra.mxu3 %v3250_v20  ;;  %v3382_v17 = vor.u32 %v3724_v13, %v3381_v12  ;;  %v3414_v20 = vor.u32 %v3732_v16, %v3413_v15  ;;  %v3445_v61 = vld [vmem:[#allocation7 + $0xd4] sm:$0xf]  ;;  %v3437_v13 = vld [vmem:[#allocation7 + $0x84] sm:$0xf] }
 0x36f   :  { %v1879_v15 = vld [vmem:[#allocation12 + $0x7] ss:$8 sm:$0x3] }
 0x370   :  { %2076 = vmatpush.bf16.msrb.mxu1 %v3254_v21  ;;  %2062 = vmatpush.bf16.msrb.mxu0 %v3322_v32  ;;  %v1728_v21 = vld [vmem:[#allocation12 + $0x6] ss:$8 sm:$0x3]  ;;  %v1881_v16 = vperm.slane %v1879_v15, 0 }
 0x371   :  { %2088 = vmatpush.bf16.msrb.mxu2 %v3326_v34 }
 0x372   :  { %2051 = vmatpush.bf16.msra.mxu3 %v3242_v38  ;;  %v3722_v38 = vld [vmem:[#allocation9 + $0x138] sm:$0xf0] }
 0x374   :  { %2077 = vmatpush.bf16.msrb.mxu1 %v3246_v40  ;;  %2063 = vmatpush.bf16.msrb.mxu0 %v3314_v44  ;;  %v3374_v40 = vor.u32 %v3722_v38, %v3373_v37  ;;  %v3721_v44 = vld [vmem:[#allocation9 + $0xe8] sm:$0xf0]  ;;  %v3737_v37 = vld [vmem:[#allocation7 + $0x6c] sm:$0xf0] }
 0x375   :  { %2089 = vmatpush.bf16.msrb.mxu2 %v3318_v46  ;;  %v3370_v46 = vor.u32 %v3721_v44, %v3369_v43  ;;  %v3735_v43 = vld [vmem:[#allocation7 + $0x1c] sm:$0xf0] }
 0x376   :  { %2052 = vmatpush.bf16.msra.mxu3 %v3234_v50  ;;  %v3720_v50 = vld [vmem:[#allocation9 + $0x98] sm:$0xf0] }
 0x378   :  { %2078 = vmatpush.bf16.msrb.mxu1 %v3238_v52  ;;  %2064 = vmatpush.bf16.msrb.mxu0 %v3306_v55  ;;  %v3366_v52 = vor.u32 %v3720_v50, %v3365_v49  ;;  %v3361_v55 = vld [vmem:[#allocation9 + $0x24] sm:$0xf]  ;;  %v3749_v49 = vld [vmem:[#allocation7 + $0x110] sm:$0xf0] }
 0x379   :  { %2090 = vmatpush.bf16.msrb.mxu2 %v3310_v58  ;;  %v3362_v58 = vor.u32 %v3719_v56, %v3361_v55  ;;  %v3482_v50 = vor.u32 %v3749_v49, %v3481_v47  ;;  %v3747_v55 = vld [vmem:[#allocation7 + $0xc0] sm:$0xf0] }
 0x37a   :  { %2232 = vmatpush.bf16.msrb.mxu3 %v3390_v5  ;;  %v3741_v5 = vld [vmem:[#allocation7 + $0x10c] sm:$0xf0] }
 0x37b   :  { %v3450_v6 = vor.u32 %v3741_v5, %v3449_v3 }
 0x37c   :  { %2065 = vmatpush.bf16.msrb.mxu0 %v3298_v63  ;;  %v3727_v63 = vld [vmem:[#allocation9 + $0x2c8] sm:$0xf0] }
 0x37d   :  { %2091 = vmatpush.bf16.msrb.mxu2 %v3302_v1  ;;  %v3394_v0 = vor.u32 %v3727_v63, %v3393_v62  ;;  %v3453_v1 = vld [vmem:[#allocation7 + $0x124] sm:$0xf]  ;;  %v3745_v62 = vld [vmem:[#allocation7 + $0x70] sm:$0xf0] }
 0x37e   :  { %2233 = vmatpush.bf16.msrb.mxu3 %v3386_v10  ;;  %v3454_v4 = vor.u32 %v3742_v2, %v3453_v1  ;;  %v3739_v10 = vld [vmem:[#allocation7 + $0xbc] sm:$0xf0] }
 0x37f   :  { %v3442_v12 = vor.u32 %v3739_v10, %v3441_v9  ;;  %v3461_v9 = vld [vmem:[#allocation7 + $0x38] sm:$0xf]  ;;  %v3744_v10 = vld [vmem:[#allocation7 + $0x48] sm:$0xf0] }
 0x380   :  { %2245 = vmatpush.bf16.msra.mxu0 %v3422_v8  ;;  %v3446_v8 = vor.u32 %v3740_v7, %v3445_v61 }
 0x382   :  { %2234 = vmatpush.bf16.msrb.mxu3 %v3382_v17 }
 0x384   :  { %2246 = vmatpush.bf16.msra.mxu0 %v3418_v14  ;;  %v3738_v14 = vld [vmem:[#allocation7 + $0x94] sm:$0xf0] }
 0x385   :  { %v3438_v17 = vor.u32 %v3738_v14, %v3437_v13  ;;  %v3743_v13 = vld [vmem:[#allocation7 + $0x20] sm:$0xf0] }
 0x388   :  { %2247 = vmatpush.bf16.msra.mxu0 %v3414_v20  ;;  %v1882_v20 = vperm.slane %v1879_v15, 1  ;;  %v2277_v15 = vld [vmem:[#allocation12 + $0x21] ss:$0 sm:$0xff] }
 0x38c   :  { %2248 = vmatpush.bf16.msra.mxu0 %v3410_v42  ;;  %v3425_v42 = vld [vmem:[#allocation7 + $0xc] sm:$0xf] }
 0x38d   :  { %v3426_v44 = vor.u32 %v3735_v43, %v3425_v42 }
 0x390   :  { %2249 = vmatpush.bf16.msra.mxu0 %v3406_v48 }
 0x394   :  { %2250 = vmatpush.bf16.msra.mxu0 %v3402_v54  ;;  %v3473_v54 = vld [vmem:[#allocation7 + $0xb0] sm:$0xf] }
 0x395   :  { %v3474_v56 = vor.u32 %v3747_v55, %v3473_v54 }
 0x398   :  { %2251 = vmatpush.bf16.msra.mxu0 %v3398_v60  ;;  %v3465_v60 = vld [vmem:[#allocation7 + $0x60] sm:$0xf] }
 0x399   :  { %v3466_v1 = vor.u32 %v3745_v62, %v3465_v60 }
 0x39c   :  { %2252 = vmatpush.bf16.msra.mxu0 %v3394_v0  ;;  %v2135_v0 = vld [vmem:[#allocation12 + $0x20] ss:$0 sm:$0xff] }
 0x3e8   :  { %v1704_v23 = vpop.f32.mrf.mxu0 }
 0x3e9   :  { %v1705_v24 = vadd.f32 %v1704_v23, %v1646_v22  ;;  %v3378_v22 = vor.u32 %v3723_v19, %v3377_v18  ;;  %v1730_v23 = vperm.slane %v1728_v21, 0 }
 0x3eb   :  { %v1708_v25 = vmul.f32 0.01, %v1705_v24  ;;  %2235 = vmatpush.bf16.msrb.mxu3 %v3378_v22 }
 0x3ed   :  { %v1709_v26 = vmax.f32 %v1705_v24, %v1708_v25 }
 0x3ef   :  { %v1726_v27 = vpack.c.bf16 %v1709_v26, %v1709_v26  ;;  %2236 = vmatpush.bf16.msrb.mxu3 %v3374_v40  ;;  %v3736_v40 = vld [vmem:[#allocation7 + $0x44] sm:$0xf0] }
 0x3f0   :  { %v1706_v28 = vpop.f32.mrf.mxu0  ;;  %v3430_v41 = vor.u32 %v3736_v40, %v3429_v39 }
 0x3f1   :  { %1822 = vmatmul.bf16.vlgmr.msra.gmra.mxu1 %v1726_v27  ;;  %1835 = vmatmul.bf16.vlgmr.msra.gmra.mxu2 %v1726_v27  ;;  %v1731_v27 = vperm.slane %v1728_v21, 1 }
 0x3f2   :  { %2326 = vmatpush.bf16.msra.mxu1 %v3454_v4 }
 0x3f3   :  { %2237 = vmatpush.bf16.msrb.mxu3 %v3370_v46  ;;  %v3750_v46 = vld [vmem:[#allocation7 + $0x138] sm:$0xf0] }
 0x3f4   :  { %v3486_v48 = vor.u32 %v3750_v46, %v3485_v45 }
 0x3f6   :  { %2327 = vmatpush.bf16.msra.mxu1 %v3450_v6  ;;  %2407 = vmatpush.bf16.msra.mxu2 %v3486_v48 }
 0x3f7   :  { %2238 = vmatpush.bf16.msrb.mxu3 %v3366_v52  ;;  %v3748_v52 = vld [vmem:[#allocation7 + $0xe8] sm:$0xf0] }
 0x3f8   :  { %v3478_v53 = vor.u32 %v3748_v52, %v3477_v51 }
 0x3fa   :  { %2328 = vmatpush.bf16.msra.mxu1 %v3446_v8  ;;  %2408 = vmatpush.bf16.msra.mxu2 %v3482_v50 }
 0x3fb   :  { %2239 = vmatpush.bf16.msrb.mxu3 %v3362_v58  ;;  %v3746_v58 = vld [vmem:[#allocation7 + $0x98] sm:$0xf0] }
 0x3fc   :  { %v3470_v59 = vor.u32 %v3746_v58, %v3469_v57 }
 0x3fe   :  { %2329 = vmatpush.bf16.msra.mxu1 %v3442_v12  ;;  %2409 = vmatpush.bf16.msra.mxu2 %v3478_v53  ;;  %v3457_v12 = vld [vmem:[#allocation7 + $0x10] sm:$0xf] }
 0x3ff   :  { %v3458_v14 = vor.u32 %v3743_v13, %v3457_v12 }
 0x402   :  { %2330 = vmatpush.bf16.msra.mxu1 %v3438_v17  ;;  %2410 = vmatpush.bf16.msra.mxu2 %v3474_v56 }
 0x406   :  { %2411 = vmatpush.bf16.msra.mxu2 %v3470_v59 }
 0x40a   :  { %2412 = vmatpush.bf16.msra.mxu2 %v3466_v1 }
 0x46e   :  { %v1823_v24 = vpop.f32.mrf.mxu1 }
 0x46f   :  { %v1824_v25 = vadd.f32 %v1823_v24, %v1730_v23 }
 0x471   :  { %v1840_v26 = vmul.f32 0.01, %v1824_v25 }
 0x473   :  { %v1842_v28 = vmax.f32 %v1824_v25, %v1840_v26 }
 0x474   :  { %v1836_v29 = vpop.f32.mrf.mxu2 }
 0x475   :  { %v1876_v30 = vpack.c.bf16 %v1842_v28, %v1842_v28  ;;  %v1837_v31 = vadd.f32 %v1836_v29, %v1731_v27 }
 0x476   :  { %v1825_v32 = vpop.f32.mrf.mxu1 }
 0x477   :  { %v1841_v33 = vmul.f32 0.01, %v1837_v31  ;;  %2053 = vmatmul.bf16.vlgmr.msra.gmra.mxu3 %v1876_v30  ;;  %2079 = vmatmul.bf16.vlgmr.msrb.gmra.mxu1 %v1876_v30 }
 0x479   :  { %v1843_v34 = vmax.f32 %v1837_v31, %v1841_v33 }
 0x47b   :  { %v1877_v35 = vpack.c.bf16 %v1843_v34, %v1843_v34 }
 0x47c   :  { %v1838_v36 = vpop.f32.mrf.mxu2 }
 0x47d   :  { %2066 = vmatmul.bf16.vlgmr.msrb.gmra.mxu0 %v1877_v35  ;;  %2092 = vmatmul.bf16.vlgmr.msrb.gmra.mxu2 %v1877_v35  ;;  %v3433_v36 = vld [vmem:[#allocation7 + $0x5c] sm:$0xf] }
 0x47e   :  { %v3434_v38 = vor.u32 %v3737_v37, %v3433_v36 }
 0x480   :  { %2331 = vmatpush.bf16.msra.mxu1 %v3434_v38 }
 0x484   :  { %2332 = vmatpush.bf16.msra.mxu1 %v3430_v41 }
 0x488   :  { %2333 = vmatpush.bf16.msra.mxu1 %v3426_v44 }
 0x4f4   :  { %v2080_v11 = vpop.f32.mrf.mxu1 }
 0x4f5   :  { %v2081_v24 = vadd.f32 %v2080_v11, %v1882_v20  ;;  %v3462_v11 = vor.u32 %v3744_v10, %v3461_v9 }
 0x4f7   :  { %2413 = vmatpush.bf16.msra.mxu2 %v3462_v11 }
 0x4fa   :  { %v2054_v18 = vpop.f32.mrf.mxu3  ;;  %v2067_v19 = vpop.f32.mrf.mxu0 }
 0x4fb   :  { %v2055_v21 = vadd.f32 %v2054_v18, %v1881_v16  ;;  %2414 = vmatpush.bf16.msra.mxu2 %v3458_v14 }
 0x4fc   :  { %v2082_v22 = vpop.f32.mrf.mxu1 }
 0x4fd   :  { %v2068_v23 = vadd.f32 %v2067_v19, %v2055_v21  ;;  %v2358_v22 = vld [vmem:[#allocation12 + $0x22] ss:$0 sm:$0xff] }
 0x4ff   :  { %v2097_v25 = vmul.f32 0.01, %v2068_v23 }
 0x500   :  { %v2093_v26 = vpop.f32.mrf.mxu2 }
 0x501   :  { %v2099_v27 = vmax.f32 %v2068_v23, %v2097_v25  ;;  %v2094_v28 = vadd.f32 %v2093_v26, %v2081_v24 }
 0x502   :  { %v2056_v29 = vpop.f32.mrf.mxu3  ;;  %v2069_v30 = vpop.f32.mrf.mxu0 }
 0x503   :  { %v2133_v31 = vpack.c.bf16 %v2099_v27, %v2099_v27  ;;  %v2098_v32 = vmul.f32 0.01, %v2094_v28 }
 0x505   :  { %v2100_v33 = vmax.f32 %v2094_v28, %v2098_v32  ;;  %2240 = vmatmul.bf16.vlgmr.msrb.gmra.mxu3 %v2133_v31 }
 0x507   :  { %v2134_v34 = vpack.c.bf16 %v2100_v33, %v2100_v33 }
 0x508   :  { %v2095_v35 = vpop.f32.mrf.mxu2 }
 0x509   :  { %2253 = vmatmul.bf16.vlgmr.msra.gmra.mxu0 %v2134_v34 }
 0x586   :  { %v2254_v63 = vpop.f32.mrf.mxu0 }
 0x588   :  { %v2241_v2 = vpop.f32.mrf.mxu3 }
 0x589   :  { %v2242_v3 = vadd.f32 %v2241_v2, %v2135_v0 }
 0x58b   :  { %v2255_v4 = vadd.f32 %v2254_v63, %v2242_v3 }
 0x58d   :  { %v2258_v5 = vmul.f32 0.01, %v2255_v4 }
 0x58e   :  { %v2256_v6 = vpop.f32.mrf.mxu0 }
 0x58f   :  { %v2259_v61 = vmax.f32 %v2255_v4, %v2258_v5 }
 0x590   :  { %v2243_v7 = vpop.f32.mrf.mxu3 }
 0x591   :  { %v2276_v8 = vpack.c.bf16 %v2259_v61, %v2259_v61 }
 0x593   :  { %2334 = vmatmul.bf16.vlgmr.msra.gmra.mxu1 %v2276_v8 }
 0x610   :  { %v2335_v16 = vpop.f32.mrf.mxu1 }
 0x611   :  { %v2336_v17 = vadd.f32 %v2335_v16, %v2277_v15 }
 0x613   :  { %v2339_v18 = vmul.f32 0.01, %v2336_v17 }
 0x615   :  { %v2340_v19 = vmax.f32 %v2336_v17, %v2339_v18 }
 0x617   :  { %v2357_v20 = vpack.c.bf16 %v2340_v19, %v2340_v19 }
 0x618   :  { %v2337_v21 = vpop.f32.mrf.mxu1 }
 0x619   :  { %2415 = vmatmul.bf16.vlgmr.msra.gmra.mxu2 %v2357_v20 }
 0x69c   :  { %v2416_v23 = vpop.f32.mrf.mxu2 }
 0x69d   :  { %v2417_v24 = vadd.f32 %v2416_v23, %v2358_v22 }
 0x69f   :  { %2420 = vst [vmem:[%s4053_s7] sm:$0xff] %v2417_v24 }
 0x6a4   :  { %v2418_v25 = vpop.f32.mrf.mxu2 }
 0x6a5   :  { %2425 = vsyncpa [#allocation3], 1 }
 0x6a6   :  { %2426 = vsyncpa [#allocation5], 1 }
 0x6a7   :  { %2427 = vsyncpa [#allocation8], 1 }
 0x6a8   :  { %2428 = vsyncpa [#allocation11], 1 }

</bundles_post_ra>
